<compile_context>
chip_gen: v7x
topology: tpu7x:2x2x1
jax: 0.10.0
libtpu: 0.0.40
codegen_flags: <defaults>
</compile_context>

<pallas_src>
import functools

import jax
import jax.numpy as jnp
from jax.experimental import pallas as pl
from jax.experimental.pallas import tpu as pltpu


def _round_up(x, m):
    return -(-x // m) * m


def _gnn_fused_kernel(a_in_ref, a_out_ref, h_ref,
                      w_cat_ref, b_cat_ref,
                      w_ih_ref, b_ih_ref,
                      out_ref, *, num_steps, mxu_dtype):
    num_graphs, n_nodes, _ = a_in_ref.shape
    rows, Hp = h_ref.shape

    # Weights / adjacency stay resident in VMEM across all steps.
    w_cat = w_cat_ref[...]           # (Hp, 5*Hp)    mxu_dtype
    w_ih = w_ih_ref[...]             # (2*Hp, 3*Hp)  mxu_dtype
    a_in = a_in_ref[...]             # (Bb, N, N)    mxu_dtype
    a_out = a_out_ref[...]           # (Bb, N, N)    mxu_dtype
    b_cat = b_cat_ref[...]           # (1, 5*Hp)     f32 (implicit row broadcast)
    b_ih = b_ih_ref[...]             # (1, 3*Hp)     f32

    def cell(_, h):
        # One wide MXU pass: [v_in | v_out | gh] = h @ [W_in^T | W_out^T | W_hh^T] + b
        y = jnp.dot(h.astype(mxu_dtype), w_cat,
                    preferred_element_type=jnp.float32) + b_cat
        v_in = y[:, :Hp].reshape(num_graphs, n_nodes, Hp).astype(mxu_dtype)
        v_out = y[:, Hp:2 * Hp].reshape(num_graphs, n_nodes, Hp).astype(mxu_dtype)
        gh = y[:, 2 * Hp:]                                   # (rows, 3*Hp) f32

        # Batched adjacency propagation (replaces the old per-graph dot loop).
        input_in = jnp.einsum('bij,bjh->bih', a_in, v_in,
                              preferred_element_type=jnp.float32)
        input_out = jnp.einsum('bij,bjh->bih', a_out, v_out,
                               preferred_element_type=jnp.float32)

        # gi = [input_in | input_out] @ w_ih^T + b_ih_eff  (single K = 2*Hp dot;
        # b_iah/b_oah are pre-folded into b_ih_eff in the wrapper).
        inputs = jnp.concatenate(
            [input_in.astype(mxu_dtype), input_out.astype(mxu_dtype)],
            axis=-1).reshape(rows, 2 * Hp)
        gi = jnp.dot(inputs, w_ih, preferred_element_type=jnp.float32) + b_ih

        # GRU-style gates; every slice is 128-lane aligned, all math in f32.
        gates = jax.nn.sigmoid(gi[:, :2 * Hp] + gh[:, :2 * Hp])
        resetgate = gates[:, :Hp]
        inputgate = gates[:, Hp:]
        newgate = jnp.tanh(gi[:, 2 * Hp:] + resetgate * gh[:, 2 * Hp:])
        return newgate + inputgate * (h - newgate)

    h0 = h_ref[...].astype(jnp.float32)
    h_final = jax.lax.fori_loop(0, num_steps, cell, h0, unroll=True)
    out_ref[...] = h_final.astype(out_ref.dtype)


def gnn_forward(A, hidden, params, step=1, graphs_per_block=None,
                mxu_dtype=jnp.bfloat16):
    """Pallas implementation of GNN.forward (step fused GNNCell applications)."""
    B, N, H = hidden.shape
    Hp = _round_up(H, 128)      # lane-dense gate slices and output stores
    Np = _round_up(N, 8)        # sublane-aligned per-graph boundaries

    # --- block size: fewer, fatter blocks; keep >=2 blocks for v7x megacore ---
    if graphs_per_block is None:
        target_rows = 1024
        Bb = max(1, min(B, target_rows // Np))
        if B >= 2:
            Bb = min(Bb, (B + 1) // 2)      # ensure at least 2 grid blocks
    else:
        Bb = max(1, int(graphs_per_block))
    B_pad = _round_up(B, Bb)
    num_blocks = B_pad // Bb
    rows_per_block = Bb * Np
    rows_total = B_pad * Np

    # --- pad inputs (zero rows/lanes stay exactly zero through the recurrence) ---
    a_in = jnp.pad(A[:, :, :N], ((0, B_pad - B), (0, Np - N), (0, Np - N)))
    a_out = jnp.pad(A[:, :, N:2 * N], ((0, B_pad - B), (0, Np - N), (0, Np - N)))
    hidden_p = jnp.pad(hidden, ((0, B_pad - B), (0, Np - N), (0, Hp - H)))
    h_flat = hidden_p.reshape(rows_total, Hp)

    # --- parameter prep (glue only; padded so every gate chunk is Hp lanes) ---
    f32 = jnp.float32
    pad_block = lambda m: jnp.pad(m, ((0, Hp - H), (0, Hp - H)))   # (H,H)->(Hp,Hp)

    def pad_gate_cols(w):      # (K, 3H) -> (K, 3Hp): per-gate lane padding
        return jnp.concatenate(
            [jnp.pad(w[:, i * H:(i + 1) * H], ((0, 0), (0, Hp - H)))
             for i in range(3)], axis=1)

    def pad_gate_bias(b):      # (3H,) -> (1, 3Hp)
        return jnp.concatenate(
            [jnp.pad(b[i * H:(i + 1) * H], (0, Hp - H)) for i in range(3)]
        ).reshape(1, 3 * Hp)

    w_hh_T = pad_gate_cols(params["w_hh"].T.astype(f32))            # (H, 3Hp)
    w_cat = jnp.concatenate(
        [pad_block(params["w_edge_in"].T.astype(f32)),
         pad_block(params["w_edge_out"].T.astype(f32)),
         jnp.pad(w_hh_T, ((0, Hp - H), (0, 0)))], axis=1)            # (Hp, 5Hp)
    b_cat = jnp.concatenate(
        [jnp.pad(params["b_edge_in"].astype(f32), (0, Hp - H)).reshape(1, Hp),
         jnp.pad(params["b_edge_out"].astype(f32), (0, Hp - H)).reshape(1, Hp),
         pad_gate_bias(params["b_hh"].astype(f32))], axis=1)         # (1, 5Hp)

    w_ih_T = params["w_ih"].T.astype(f32)                            # (2H, 3H)
    w_ih_a, w_ih_b = w_ih_T[:H], w_ih_T[H:]
    w_ih_pad = jnp.concatenate(
        [jnp.pad(pad_gate_cols(w_ih_a), ((0, Hp - H), (0, 0))),
         jnp.pad(pad_gate_cols(w_ih_b), ((0, Hp - H), (0, 0)))], axis=0)  # (2Hp,3Hp)
    # Fold b_iah / b_oah into an effective b_ih (algebraically identical, f32).
    b_ih_eff = (params["b_ih"].astype(f32)
                + params["b_iah"].astype(f32) @ w_ih_a
                + params["b_oah"].astype(f32) @ w_ih_b)
    b_ih_pad = pad_gate_bias(b_ih_eff)                               # (1, 3Hp)

    # MXU operands in mxu_dtype (bf16 by default); biases stay f32.
    a_in = a_in.astype(mxu_dtype)
    a_out = a_out.astype(mxu_dtype)
    w_cat = w_cat.astype(mxu_dtype)
    w_ih_pad = w_ih_pad.astype(mxu_dtype)

    # --- cost estimate + explicit VMEM budget ---
    mxu_bytes = jnp.dtype(mxu_dtype).itemsize
    h_bytes = jnp.dtype(hidden.dtype).itemsize
    steps = int(step)
    flops = steps * 2 * (rows_total * Hp * 5 * Hp            # wide h-side matmul
                         + 2 * B_pad * Np * Np * Hp          # adjacency propagation
                         + rows_total * 2 * Hp * 3 * Hp)     # gi matmul
    cost = pl.CostEstimate(
        flops=int(flops),
        transcendentals=int(steps * rows_total * 3 * Hp),
        bytes_accessed=int(2 * B_pad * Np * Np * mxu_bytes
                           + 2 * rows_total * Hp * h_bytes
                           + (5 * Hp * Hp + 6 * Hp * Hp) * mxu_bytes
                           + 8 * Hp * 4))
    vmem_est = (2 * (2 * Bb * Np * Np * mxu_bytes + rows_per_block * Hp * h_bytes)
                + 2 * rows_per_block * Hp * h_bytes
                + 2 * ((5 * Hp * Hp + 6 * Hp * Hp) * mxu_bytes + 8 * Hp * 4)
                + rows_per_block * Hp * 16 * 4)              # live f32 intermediates
    vmem_limit = int(min(max(2 * vmem_est, 32 << 20), 64 << 20))

    full2d = lambda shape: pl.BlockSpec(shape, lambda g: (0, 0))

    out_flat = pl.pallas_call(
        functools.partial(_gnn_fused_kernel, num_steps=steps, mxu_dtype=mxu_dtype),
        out_shape=jax.ShapeDtypeStruct((rows_total, Hp), hidden.dtype),
        grid=(num_blocks,),
        in_specs=[
            pl.BlockSpec((Bb, Np, Np), lambda g: (g, 0, 0)),        # A_in
            pl.BlockSpec((Bb, Np, Np), lambda g: (g, 0, 0)),        # A_out
            pl.BlockSpec((rows_per_block, Hp), lambda g: (g, 0)),   # hidden (flat)
            full2d((Hp, 5 * Hp)),                                   # W_cat
            full2d((1, 5 * Hp)),                                    # b_cat
            full2d((2 * Hp, 3 * Hp)),                               # W_ih^T (padded)
            full2d((1, 3 * Hp)),                                    # b_ih_eff
        ],
        out_specs=pl.BlockSpec((rows_per_block, Hp), lambda g: (g, 0)),
        compiler_params=pltpu.CompilerParams(
            dimension_semantics=("parallel",),
            vmem_limit_bytes=vmem_limit),
        cost_estimate=cost,
    )(a_in, a_out, h_flat, w_cat, b_cat, w_ih_pad, b_ih_pad)

    return out_flat.reshape(B_pad, Np, Hp)[:B, :N, :H]


def _gnn_ref(A, hidden, params, step=1):
    """Pure-JAX reference, mirroring the PyTorch GNNCell exactly (f32)."""
    B, N, H = hidden.shape
    for _ in range(step):
        v_in = hidden @ params["w_edge_in"].T + params["b_edge_in"]
        v_out = hidden @ params["w_edge_out"].T + params["b_edge_out"]
        input_in = jnp.einsum("bij,bjh->bih", A[:, :, :N], v_in) + params["b_iah"]
        input_out = jnp.einsum("bij,bjh->bih", A[:, :, N:2 * N], v_out) + params["b_oah"]
        inputs = jnp.concatenate([input_in, input_out], axis=2)
        gi = inputs @ params["w_ih"].T + params["b_ih"]
        gh = hidden @ params["w_hh"].T + params["b_hh"]
        i_r, i_i, i_n = jnp.split(gi, 3, axis=2)
        h_r, h_i, h_n = jnp.split(gh, 3, axis=2)
        resetgate = jax.nn.sigmoid(i_r + h_r)
        inputgate = jax.nn.sigmoid(i_i + h_i)
        newgate = jnp.tanh(i_n + resetgate * h_n)
        hidden = newgate + inputgate * (hidden - newgate)
    return hidden


if __name__ == "__main__":
    key = jax.random.PRNGKey(0)
    B, N, H = 2, 8, 32      # batch, num graph nodes, hidden_size
    STEP = 2

    keys = jax.random.split(key, 12)
    stdv = 1.0 / (H ** 0.5)
    u = lambda k, shape: jax.random.uniform(k, shape, jnp.float32, -stdv, stdv)

    params = {
        "w_ih": u(keys[0], (3 * H, 2 * H)),
        "w_hh": u(keys[1], (3 * H, H)),
        "b_ih": u(keys[2], (3 * H,)),
        "b_hh": u(keys[3], (3 * H,)),
        "b_iah": u(keys[4], (H,)),
        "b_oah": u(keys[5], (H,)),
        "w_edge_in": u(keys[6], (H, H)),
        "b_edge_in": u(keys[7], (H,)),
        "w_edge_out": u(keys[8], (H, H)),
        "b_edge_out": u(keys[9], (H,)),
    }

    A = jax.random.uniform(keys[10], (B, N, 2 * N), dtype=jnp.float32)
    hidden = jax.random.normal(keys[11], (B, N, H), dtype=jnp.float32)

    ref = _gnn_ref(A, hidden, params, step=STEP)

    # Exact path: f32 MXU operands, tight tolerance against the reference.
    out_f32 = jax.block_until_ready(
        gnn_forward(A, hidden, params, step=STEP, mxu_dtype=jnp.float32))
    err_f32 = float(jnp.max(jnp.abs(out_f32 - ref)))
    assert jnp.allclose(out_f32, ref, rtol=1e-4, atol=1e-4), f"f32 max_err={err_f32}"

    # Fast path (default): bf16 MXU operands with f32 accumulation / gate math.
    # Loose tolerance: reduced-precision matmul inputs over `step` recurrences.
    out_bf16 = jax.block_until_ready(
        gnn_forward(A, hidden, params, step=STEP, mxu_dtype=jnp.bfloat16))
    err_bf16 = float(jnp.max(jnp.abs(out_bf16 - ref)))
    assert jnp.allclose(out_bf16, ref, rtol=1e-1, atol=2e-1), f"bf16 max_err={err_bf16}"

    print("KERNEL_OK")
</pallas_src>

<mosaic_0001>
module attributes {stable_mosaic.version = 11 : i64} {
  func.func @_gnn_fused_kernel(%arg0: i32, %arg1: memref<1x8x8xf32, #tpu.memory_space<vmem>>, %arg2: memref<1x8x8xf32, #tpu.memory_space<vmem>>, %arg3: memref<8x128xf32, #tpu.memory_space<vmem>>, %arg4: memref<128x640xf32, #tpu.memory_space<vmem>>, %arg5: memref<1x640xf32, #tpu.memory_space<vmem>>, %arg6: memref<256x384xf32, #tpu.memory_space<vmem>>, %arg7: memref<1x384xf32, #tpu.memory_space<vmem>>, %arg8: memref<8x128xf32, #tpu.memory_space<vmem>>) attributes {dimension_semantics = [#tpu.dimension_semantics<parallel>], iteration_bounds = array<i64: 2>, scalar_prefetch = 0 : i64, scratch_operands = 0 : i64, tpu.core_type = #tpu.core_type<tc>, window_params = [{transform_indices = @transform_0, window_bounds = array<i64: 1, 8, 8>}, {transform_indices = @transform_1, window_bounds = array<i64: 1, 8, 8>}, {transform_indices = @transform_2, window_bounds = array<i64: 8, 128>}, {pipeline_mode = #tpu.pipeline_mode<synchronous>, transform_indices = @transform_3, window_bounds = array<i64: 128, 640>}, {pipeline_mode = #tpu.pipeline_mode<synchronous>, transform_indices = @transform_4, window_bounds = array<i64: 1, 640>}, {pipeline_mode = #tpu.pipeline_mode<synchronous>, transform_indices = @transform_5, window_bounds = array<i64: 256, 384>}, {pipeline_mode = #tpu.pipeline_mode<synchronous>, transform_indices = @transform_6, window_bounds = array<i64: 1, 384>}, {transform_indices = @transform_7, window_bounds = array<i64: 8, 128>}]} {
    %c0 = arith.constant 0 : index
    %c0_0 = arith.constant 0 : index
    %0 = vector.load %arg4[%c0, %c0_0] : memref<128x640xf32, #tpu.memory_space<vmem>>, vector<128x640xf32>
    %c0_1 = arith.constant 0 : index
    %c0_2 = arith.constant 0 : index
    %1 = vector.load %arg6[%c0_1, %c0_2] : memref<256x384xf32, #tpu.memory_space<vmem>>, vector<256x384xf32>
    %c0_3 = arith.constant 0 : index
    %c0_4 = arith.constant 0 : index
    %c0_5 = arith.constant 0 : index
    %2 = vector.load %arg1[%c0_3, %c0_4, %c0_5] : memref<1x8x8xf32, #tpu.memory_space<vmem>>, vector<1x8x8xf32>
    %c0_6 = arith.constant 0 : index
    %c0_7 = arith.constant 0 : index
    %c0_8 = arith.constant 0 : index
    %3 = vector.load %arg2[%c0_6, %c0_7, %c0_8] : memref<1x8x8xf32, #tpu.memory_space<vmem>>, vector<1x8x8xf32>
    %c0_9 = arith.constant 0 : index
    %c0_10 = arith.constant 0 : index
    %4 = vector.load %arg5[%c0_9, %c0_10] : memref<1x640xf32, #tpu.memory_space<vmem>>, vector<1x640xf32>
    %c0_11 = arith.constant 0 : index
    %c0_12 = arith.constant 0 : index
    %5 = vector.load %arg7[%c0_11, %c0_12] : memref<1x384xf32, #tpu.memory_space<vmem>>, vector<1x384xf32>
    %c0_13 = arith.constant 0 : index
    %c0_14 = arith.constant 0 : index
    %6 = vector.load %arg3[%c0_13, %c0_14] : memref<8x128xf32, #tpu.memory_space<vmem>>, vector<8x128xf32>
    %c0_i32 = arith.constant 0 : i32
    %cst = arith.constant dense<0.000000e+00> : vector<8x640xf32>
    %7 = tpu.matmul %6, %0, %cst {dimension_numbers = #tpu.dot_dimension_numbers<[1], [0], [0], [1], [0, 0, 1, 1], [], []>} : vector<8x128xf32>, vector<128x640xf32>, vector<8x640xf32> -> vector<8x640xf32>
    %8 = vector.broadcast %4 : vector<1x640xf32> to vector<8x640xf32>
    %9 = arith.addf %7, %8 : vector<8x640xf32>
    %10 = vector.extract_strided_slice %9 {offsets = [0, 0], sizes = [8, 128], strides = [1, 1]} : vector<8x640xf32> to vector<8x128xf32>
    %11 = vector.shape_cast %10 : vector<8x128xf32> to vector<1x8x128xf32>
    %12 = vector.extract_strided_slice %9 {offsets = [0, 128], sizes = [8, 128], strides = [1, 1]} : vector<8x640xf32> to vector<8x128xf32>
    %13 = vector.shape_cast %12 : vector<8x128xf32> to vector<1x8x128xf32>
    %14 = vector.extract_strided_slice %9 {offsets = [0, 256], sizes = [8, 384], strides = [1, 1]} : vector<8x640xf32> to vector<8x384xf32>
    "tpu.trace_start"() <{level = 10 : i32, message = "bij,bjh->bih"}> : () -> ()
    %cst_15 = arith.constant dense<0.000000e+00> : vector<1x8x128xf32>
    %15 = tpu.matmul %2, %11, %cst_15 {dimension_numbers = #tpu.dot_dimension_numbers<[2], [1], [1], [2], [0, 0, 0, 1, 1, 2], [0], [0]>} : vector<1x8x8xf32>, vector<1x8x128xf32>, vector<1x8x128xf32> -> vector<1x8x128xf32>
    %cst_16 = arith.constant dense<0.000000e+00> : vector<1x8x128xf32>
    %16 = tpu.matmul %3, %13, %cst_16 {dimension_numbers = #tpu.dot_dimension_numbers<[2], [1], [1], [2], [0, 0, 0, 1, 1, 2], [0], [0]>} : vector<1x8x8xf32>, vector<1x8x128xf32>, vector<1x8x128xf32> -> vector<1x8x128xf32>
    "tpu.trace_stop"() : () -> ()
    %17 = tpu.concatenate %15, %16 in 2 : vector<1x8x128xf32>, vector<1x8x128xf32> -> vector<1x8x256xf32>
    %18 = vector.shape_cast %17 : vector<1x8x256xf32> to vector<8x256xf32>
    %cst_17 = arith.constant dense<0.000000e+00> : vector<8x384xf32>
    %19 = tpu.matmul %18, %1, %cst_17 {dimension_numbers = #tpu.dot_dimension_numbers<[1], [0], [0], [1], [0, 0, 1, 1], [], []>} : vector<8x256xf32>, vector<256x384xf32>, vector<8x384xf32> -> vector<8x384xf32>
    %20 = vector.broadcast %5 : vector<1x384xf32> to vector<8x384xf32>
    %21 = arith.addf %19, %20 : vector<8x384xf32>
    %22 = vector.extract_strided_slice %21 {offsets = [0, 0], sizes = [8, 256], strides = [1, 1]} : vector<8x384xf32> to vector<8x256xf32>
    %23 = vector.extract_strided_slice %14 {offsets = [0, 0], sizes = [8, 256], strides = [1, 1]} : vector<8x384xf32> to vector<8x256xf32>
    %24 = arith.addf %22, %23 : vector<8x256xf32>
    %25 = arith.negf %24 : vector<8x256xf32>
    %26 = math.exp %25 : vector<8x256xf32>
    %cst_18 = arith.constant 1.000000e+00 : f32
    %27 = vector.broadcast %cst_18 : f32 to vector<8x256xf32>
    %28 = arith.addf %27, %26 : vector<8x256xf32>
    %29 = arith.divf %27, %28 : vector<8x256xf32>
    %30 = vector.extract_strided_slice %29 {offsets = [0, 0], sizes = [8, 128], strides = [1, 1]} : vector<8x256xf32> to vector<8x128xf32>
    %31 = vector.extract_strided_slice %29 {offsets = [0, 128], sizes = [8, 128], strides = [1, 1]} : vector<8x256xf32> to vector<8x128xf32>
    %32 = vector.extract_strided_slice %21 {offsets = [0, 256], sizes = [8, 128], strides = [1, 1]} : vector<8x384xf32> to vector<8x128xf32>
    %33 = vector.extract_strided_slice %14 {offsets = [0, 256], sizes = [8, 128], strides = [1, 1]} : vector<8x384xf32> to vector<8x128xf32>
    %34 = arith.mulf %30, %33 : vector<8x128xf32>
    %35 = arith.addf %32, %34 : vector<8x128xf32>
    %36 = math.tanh %35 : vector<8x128xf32>
    %37 = arith.subf %6, %36 : vector<8x128xf32>
    %38 = arith.mulf %31, %37 : vector<8x128xf32>
    %39 = arith.addf %36, %38 : vector<8x128xf32>
    %c1_i32 = arith.constant 1 : i32
    %cst_19 = arith.constant dense<0.000000e+00> : vector<8x640xf32>
    %40 = tpu.matmul %39, %0, %cst_19 {dimension_numbers = #tpu.dot_dimension_numbers<[1], [0], [0], [1], [0, 0, 1, 1], [], []>} : vector<8x128xf32>, vector<128x640xf32>, vector<8x640xf32> -> vector<8x640xf32>
    %41 = vector.broadcast %4 : vector<1x640xf32> to vector<8x640xf32>
    %42 = arith.addf %40, %41 : vector<8x640xf32>
    %43 = vector.extract_strided_slice %42 {offsets = [0, 0], sizes = [8, 128], strides = [1, 1]} : vector<8x640xf32> to vector<8x128xf32>
    %44 = vector.shape_cast %43 : vector<8x128xf32> to vector<1x8x128xf32>
    %45 = vector.extract_strided_slice %42 {offsets = [0, 128], sizes = [8, 128], strides = [1, 1]} : vector<8x640xf32> to vector<8x128xf32>
    %46 = vector.shape_cast %45 : vector<8x128xf32> to vector<1x8x128xf32>
    %47 = vector.extract_strided_slice %42 {offsets = [0, 256], sizes = [8, 384], strides = [1, 1]} : vector<8x640xf32> to vector<8x384xf32>
    "tpu.trace_start"() <{level = 10 : i32, message = "bij,bjh->bih"}> : () -> ()
    %cst_20 = arith.constant dense<0.000000e+00> : vector<1x8x128xf32>
    %48 = tpu.matmul %2, %44, %cst_20 {dimension_numbers = #tpu.dot_dimension_numbers<[2], [1], [1], [2], [0, 0, 0, 1, 1, 2], [0], [0]>} : vector<1x8x8xf32>, vector<1x8x128xf32>, vector<1x8x128xf32> -> vector<1x8x128xf32>
    %cst_21 = arith.constant dense<0.000000e+00> : vector<1x8x128xf32>
    %49 = tpu.matmul %3, %46, %cst_21 {dimension_numbers = #tpu.dot_dimension_numbers<[2], [1], [1], [2], [0, 0, 0, 1, 1, 2], [0], [0]>} : vector<1x8x8xf32>, vector<1x8x128xf32>, vector<1x8x128xf32> -> vector<1x8x128xf32>
    "tpu.trace_stop"() : () -> ()
    %50 = tpu.concatenate %48, %49 in 2 : vector<1x8x128xf32>, vector<1x8x128xf32> -> vector<1x8x256xf32>
    %51 = vector.shape_cast %50 : vector<1x8x256xf32> to vector<8x256xf32>
    %cst_22 = arith.constant dense<0.000000e+00> : vector<8x384xf32>
    %52 = tpu.matmul %51, %1, %cst_22 {dimension_numbers = #tpu.dot_dimension_numbers<[1], [0], [0], [1], [0, 0, 1, 1], [], []>} : vector<8x256xf32>, vector<256x384xf32>, vector<8x384xf32> -> vector<8x384xf32>
    %53 = vector.broadcast %5 : vector<1x384xf32> to vector<8x384xf32>
    %54 = arith.addf %52, %53 : vector<8x384xf32>
    %55 = vector.extract_strided_slice %54 {offsets = [0, 0], sizes = [8, 256], strides = [1, 1]} : vector<8x384xf32> to vector<8x256xf32>
    %56 = vector.extract_strided_slice %47 {offsets = [0, 0], sizes = [8, 256], strides = [1, 1]} : vector<8x384xf32> to vector<8x256xf32>
    %57 = arith.addf %55, %56 : vector<8x256xf32>
    %58 = arith.negf %57 : vector<8x256xf32>
    %59 = math.exp %58 : vector<8x256xf32>
    %cst_23 = arith.constant 1.000000e+00 : f32
    %60 = vector.broadcast %cst_23 : f32 to vector<8x256xf32>
    %61 = arith.addf %60, %59 : vector<8x256xf32>
    %62 = arith.divf %60, %61 : vector<8x256xf32>
    %63 = vector.extract_strided_slice %62 {offsets = [0, 0], sizes = [8, 128], strides = [1, 1]} : vector<8x256xf32> to vector<8x128xf32>
    %64 = vector.extract_strided_slice %62 {offsets = [0, 128], sizes = [8, 128], strides = [1, 1]} : vector<8x256xf32> to vector<8x128xf32>
    %65 = vector.extract_strided_slice %54 {offsets = [0, 256], sizes = [8, 128], strides = [1, 1]} : vector<8x384xf32> to vector<8x128xf32>
    %66 = vector.extract_strided_slice %47 {offsets = [0, 256], sizes = [8, 128], strides = [1, 1]} : vector<8x384xf32> to vector<8x128xf32>
    %67 = arith.mulf %63, %66 : vector<8x128xf32>
    %68 = arith.addf %65, %67 : vector<8x128xf32>
    %69 = math.tanh %68 : vector<8x128xf32>
    %70 = arith.subf %39, %69 : vector<8x128xf32>
    %71 = arith.mulf %64, %70 : vector<8x128xf32>
    %72 = arith.addf %69, %71 : vector<8x128xf32>
    %c0_24 = arith.constant 0 : index
    %c0_25 = arith.constant 0 : index
    %73 = vector.load %arg8[%c0_24, %c0_25] : memref<8x128xf32, #tpu.memory_space<vmem>>, vector<8x128xf32>
    tpu.vector_store %arg8[%c0_24, %c0_25], %72 {strides = array<i32>} : memref<8x128xf32, #tpu.memory_space<vmem>>, vector<8x128xf32>,
    return
  }
  func.func @transform_0(%arg0: i32) -> (i32, i32, i32) {
    %c0_i32 = arith.constant 0 : i32
    %c0_i32_0 = arith.constant 0 : i32
    %c0_i32_1 = arith.constant 0 : i32
    return %arg0, %c0_i32, %c0_i32_0 : i32, i32, i32
  }
  func.func @transform_1(%arg0: i32) -> (i32, i32, i32) {
    %c0_i32 = arith.constant 0 : i32
    %c0_i32_0 = arith.constant 0 : i32
    %c0_i32_1 = arith.constant 0 : i32
    return %arg0, %c0_i32, %c0_i32_0 : i32, i32, i32
  }
  func.func @transform_2(%arg0: i32) -> (i32, i32) {
    %c0_i32 = arith.constant 0 : i32
    %c0_i32_0 = arith.constant 0 : i32
    return %arg0, %c0_i32 : i32, i32
  }
  func.func @transform_3(%arg0: i32) -> (i32, i32) {
    %c0_i32 = arith.constant 0 : i32
    %c0_i32_0 = arith.constant 0 : i32
    %c0_i32_1 = arith.constant 0 : i32
    return %c0_i32, %c0_i32_0 : i32, i32
  }
  func.func @transform_4(%arg0: i32) -> (i32, i32) {
    %c0_i32 = arith.constant 0 : i32
    %c0_i32_0 = arith.constant 0 : i32
    %c0_i32_1 = arith.constant 0 : i32
    return %c0_i32, %c0_i32_0 : i32, i32
  }
  func.func @transform_5(%arg0: i32) -> (i32, i32) {
    %c0_i32 = arith.constant 0 : i32
    %c0_i32_0 = arith.constant 0 : i32
    %c0_i32_1 = arith.constant 0 : i32
    return %c0_i32, %c0_i32_0 : i32, i32
  }
  func.func @transform_6(%arg0: i32) -> (i32, i32) {
    %c0_i32 = arith.constant 0 : i32
    %c0_i32_0 = arith.constant 0 : i32
    %c0_i32_1 = arith.constant 0 : i32
    return %c0_i32, %c0_i32_0 : i32, i32
  }
  func.func @transform_7(%arg0: i32) -> (i32, i32) {
    %c0_i32 = arith.constant 0 : i32
    %c0_i32_0 = arith.constant 0 : i32
    return %arg0, %c0_i32 : i32, i32
  }
}

</mosaic_0001>

<bundles_post_ra>
// kernel: tpu_custom_call.1
= control target key start
LH: loop header
LB: loop body
LE: loop exit
PB: predicated region body
PF: predicated region fallthrough
CT: control target
= control target key end

     0   :  { %s3559_s0 = inlined_call_operand.hbm [shape: f32[2,8,8], index: 0, kind: input, shape index: {}]   ;;  %s3560_s1 = inlined_call_operand.hbm [shape: f32[2,8,8], index: 1, kind: input, shape index: {}]   ;;  %s3561_s2 = inlined_call_operand.hbm [shape: f32[16,128], index: 2, kind: input, shape index: {}]   ;;  %s3562_s3 = inlined_call_operand.hbm [shape: f32[128,640], index: 3, kind: input, shape index: {}]   ;;  %s3563_s4 = inlined_call_operand.vmem [shape: f32[1,640], index: 4, kind: input, shape index: {}]   ;;  %s3564_s5 = inlined_call_operand.hbm [shape: f32[256,384], index: 5, kind: input, shape index: {}]   ;;  %s3565_s6 = inlined_call_operand.vmem [shape: f32[1,384], index: 6, kind: input, shape index: {}]   ;;  %s3566_s7 = inlined_call_operand.hbm [shape: f32[16,128], index: 7, kind: output, shape index: {}]  }
   0x1   :  { %3632 = sst [smem:[#allocation63_spill]] %s3560_s1 }
   0x2   :  { %3633 = sst [smem:[#allocation64_spill]] %s3562_s3 }
   0x3   :  { %12 = vsyncpa [#allocation3], 0 }
   0x4   :  { %14 = vsyncpa [#allocation3 + $0x1], 0 }
   0x5   :  { %15 = vsyncpa [#allocation6], 0 }
   0x6   :  { %17 = vsyncpa [#allocation6 + $0x1], 0 }
   0x7   :  { %18 = vsyncpa [#allocation9], 0 }
   0x8   :  { %19 = vsyncpa [#allocation4], 0 }
   0x9   :  { %21 = vsyncpa [#allocation4 + $0x1], 0  ;;  %s2788_s24 = smov 0   ;;  %s2790_s25 = smov 0  }
   0xa   :  { %s2792_s26 = smov 0   ;;  %s2794_s27 = smov 0  }
   0xb LB: > { %3634 = sst [smem:[#allocation16_spill]] %s2721_s24  ;;  %s2809_s28 = sadd.s32 4294967295, %s2733_s27   ;;  %s2733_s27 = sphi %s2794_s27, %s3754_s27   ;;  %s2729_s26 = sphi %s2792_s26, %s3758_s26   ;;  %s2725_s25 = sphi %s2790_s25, %s3757_s25   ;;  %s2721_s24 = sphi %s2788_s24, %s3756_s24  }
   0xc   : > { %3635 = sst [smem:[#allocation17_spill]] %s2733_s27  ;;  %s1797_s29 = sadd.s32 4294967294, %s2733_s27  }
   0xd   : > { %p47_p0 = scmp.ne.s32.totalorder %s2725_s25, %s2721_s24  ;;  %p3567_p1 = scmp.eq.s32.totalorder %s2809_s28, 0 }
   0xe   : > { %p213_p3 = scmp.eq.s32.totalorder %s1797_s29, 1  ;;  %p1798_p5 = scmp.ge.s32.totalorder %s2733_s27, 1 }
   0xf   : > { %p2818_p4 = por %p3567_p1, %p47_p0  ;;  %p220_p7 = scmp.lt.s32.totalorder %s2733_s27, 3 }
  0x10   : > { %p2823_p6 = por %p213_p3, %p47_p0  ;;  %s2735_s10 = smov [#allocation8]  }
  0x11   : > { %s3636_s30 = scalar_select %p2818_p4, 1, 0 }
  0x12   : > { %s3637_s8 = scalar_select %p2823_p6, 1, 0 }
  0x13   : > { %p2828_p8 = pnand %p1798_p5, %p220_p7  ;;  %s232_s11 = sshll.u32 %s2735_s10, 4  ;;  %s2832_s11 = int_to_ptr.vmem [resolvable:$true] %s232_s11 }
  0x14   : > { %3638 = sst [smem:[#allocation18_spill]] %s3637_s8  ;;  %s2844_s13 = sadd.s32 1, %s2733_s27  }
  0x15   : > { %s3639_s9 = scalar_select %p2828_p8, 1, 0 }
  0x16   : > { %p2425_p9 = pneg %p2828_p8  ;;  %3641 = sst [smem:[#allocation19_spill]] %s2844_s13 }
  0x17   : > { %s34_s14 = sadd.s32 1, %s2729_s26  ;;  %s31_s15 = ssub.s32 %s2733_s27, %s2844_s13 }
  0x18   : > { %p2839_p11 = pnand %p2425_p9, %p3567_p1  ;;  %s3642_s3 = sld [smem:[#allocation64_spill]] }
  0x1a   : > { %s3640_s12 = scalar_select %p2839_p11, 1, 0 }
  0x1b   : > { %p3571_p13 = pneg %p2839_p11 }
  0x1e   : > { %s2513_s18 = scalar_lea.hbm %s3642_s3, 10240 }
  0x1f   : > { %p2514_p12 = scmp.ne.s32.totalorder %s3642_s3, %s2513_s18  ;;  %p2520_p5 = scmp.lt.u32.totalorder %s2513_s18, %s3642_s3 }
  0x21   : > { %p2516_p0 = pnand %p3571_p13, %p2514_p12 }
  0x23   : > { %p2517_p3 = pneg %p2516_p0 }
  0x25   : > { %p2522_p7 = pnand %p2520_p5, %p2517_p3 }
  0x27   : > { %2525 = shalt.err (!%p2522_p7)
}
  0x28   : > { %s2526_s23 = scalar_lea.vmem %s2832_s11, 10240  ;;  %p2534_p2 = scmp.lt.s32.totalorder %s2832_s11, %s2832_s11 }
  0x29   : > { %p2527_p9 = scmp.ne.s32.totalorder %s2832_s11, %s2526_s23  ;;  %p2535_p12 = scmp.lt.s32.totalorder %s2526_s23, %s2526_s23 }
  0x2b   : > { %p2529_p10 = pnand %p2527_p9, %p3571_p13  ;;  %p2536_p0 = por %p2535_p12, %p2534_p2 }
  0x2d   : > { %p2530_p1 = pneg %p2529_p10 }
  0x2f   : > { %p2537_p6 = pnand %p2536_p0, %p2530_p1 }
  0x31   : > { %2540 = shalt.err (!%p2537_p6)
}
  0x32   : > { %s2736_s29 = smov 640   ;;  %s2737_s10 = smov 40  }
  0x33   : > { %2428 = dma.hbm_to_vmem [thread:$0]  (!%p2839_p11), %s3642_s3, 10240, %s2832_s11, [#allocation9], %s2736_s29, %s2736_s29, %s2737_s10  }
  0x34   : > { %p32_p1 = scmp.eq.s32.totalorder %s31_s15, 0  ;;  %p41_p2 = scmp.ne.s32.totalorder %s2729_s26, %s2725_s25 }
  0x35   : > { %p42_p6 = scmp.eq.s32.totalorder %s2733_s27, 0  ;;  %p2448_p10 = scmp.lt.s32.totalorder %s2733_s27, 2 }
  0x36   : > { %s2881_s18 = scalar_select %p32_p1, %s2729_s26, %s34_s14  }
  0x37   : > { %p43_p3 = por %p42_p6, %p41_p2  ;;  %p3644_p5 = scmp.eq.s32.totalorder %s2809_s28, 1 }
  0x38   : > { %3643 = sst [smem:[#allocation20_spill]] %s2881_s18  ;;  %s3568_s20 = sand.u32 1, %s2729_s26  }
  0x39   : > { %p2885_p7 = por %p3644_p5, %p41_p2  ;;  %s2891_s21 = sshll.u32 %s2733_s27, 7 }
  0x3a   : > { %s2895_s22 = sshll.u32 %s3568_s20, 3  ;;  %p2897_p9 = pnand %p2448_p10, %p43_p3 }
  0x3b   : > { %s3645_s19 = scalar_select %p2885_p7, 1, 0 }
  0x3c   : > { %s3646_s11 = scalar_select %p2897_p9, 1, 0 }
  0x3d   : > { %s283_s14 = sand.u32 1, %s2733_s27   ;;  %s3647_s1 = sld [smem:[#allocation63_spill]] }
  0x3e   : > { %s287_s10 = scalar_lea.vmem [#allocation5], %s2895_s22  ;;  %s2911_s17 = scalar_lea.sflag [#allocation6], %s283_s14 }
  0x3f   : > { %s294_s16 = sshll.u32 %s287_s10, 4  ;;  %p2917_p0 = pneg %p2897_p9  ;;  %s2909_s16 = int_to_ptr.vmem [resolvable:$true] %s294_s16 }
  0x41   : > { %s3648_s3 = scalar_select %p2917_p0, 1, 0 }
  0x43   : > { %s2906_s29 = scalar_lea.hbm %s3647_s1, %s2891_s21  ;;  %s2546_s18 = scalar_lea.hbm %s3647_s1, 256 }
  0x44   : > { %s2541_s20 = scalar_lea.hbm %s2906_s29, 128  ;;  %p2547_p6 = scmp.lt.u32.totalorder %s2906_s29, %s3647_s1 }
  0x45   : > { %p2542_p12 = scmp.ne.s32.totalorder %s2906_s29, %s2541_s20  ;;  %p2548_p10 = scmp.lt.u32.totalorder %s2546_s18, %s2541_s20 }
  0x46   : > { %p2550_p5 = scmp.lt.u32.totalorder %s2541_s20, %s2906_s29 }
  0x47   : > { %p2544_p1 = pnand %p2917_p0, %p2542_p12  ;;  %p2549_p3 = por %p2548_p10, %p2547_p6 }
  0x49   : > { %p2545_p2 = pneg %p2544_p1  ;;  %p2551_p13 = por %p2550_p5, %p2549_p3 }
  0x4b   : > { %p2552_p7 = pnand %p2551_p13, %p2545_p2 }
  0x4d   : > { %2555 = shalt.err (!%p2552_p7)
}
  0x4e   : > { %s2556_s14 = scalar_lea.vmem %s2909_s16, 128  ;;  %s2738_s15 = smov [#allocation5]  }
  0x4f   : > { %p2557_p12 = scmp.ne.s32.totalorder %s2909_s16, %s2556_s14  ;;  %s2561_s23 = sshll.u32 %s2738_s15, 4  ;;  %s2562_s23 = int_to_ptr.vmem [resolvable:$false] %s2561_s23 }
  0x50   : > { %s2563_s13 = scalar_lea.vmem %s2562_s23, 256  ;;  %p2564_p8 = scmp.lt.s32.totalorder %s2909_s16, %s2562_s23 }
  0x51   : > { %p2559_p1 = pnand %p2557_p12, %p2917_p0  ;;  %p2565_p11 = scmp.lt.s32.totalorder %s2563_s13, %s2556_s14 }
  0x53   : > { %p2560_p4 = pneg %p2559_p1  ;;  %p2566_p6 = por %p2565_p11, %p2564_p8 }
  0x55   : > { %p2567_p10 = pnand %p2566_p6, %p2560_p4 }
  0x57   : > { %2570 = shalt.err (!%p2567_p10)
}
  0x58   : > { %2438 = dma.hbm_to_vmem [thread:$0]  (!%p2897_p9), %s2906_s29, 128, %s2909_s16, %s2911_s17  }
  0x59   : > { %s2739_s18 = smov [#allocation10]   ;;  %s2571_s15 = scalar_lea.hbm %s3564_s5, 12288 }
  0x5a   : > { %s248_s20 = sshll.u32 %s2739_s18, 4  ;;  %p2572_p8 = scmp.ne.s32.totalorder %s3564_s5, %s2571_s15  ;;  %s249_s20 = int_to_ptr.vmem [resolvable:$true] %s248_s20 }
  0x5b   : > { %p3649_p4 = scmp.ne.s32.totalorder %s3640_s12, 0  ;;  %p2578_p2 = scmp.lt.u32.totalorder %s2571_s15, %s3564_s5 }
  0x5d   : > { %p3650_p11 = pneg %p3649_p4 }
  0x5f   : > { %p2574_p13 = pnand %p2572_p8, %p3650_p11 }
  0x61   : > { %p2575_p7 = pneg %p2574_p13 }
  0x63   : > { %p2580_p3 = pnand %p2578_p2, %p2575_p7 }
  0x65   : > { %2583 = shalt.err (!%p2580_p3)
}
  0x66   : > { %s2584_s29 = scalar_lea.vmem %s249_s20, 12288  ;;  %p3651_p12 = pmov %p3650_p11 }
  0x67   : > { %p2585_p5 = scmp.ne.s32.totalorder %s249_s20, %s2584_s29  ;;  %p2592_p10 = scmp.lt.s32.totalorder %s249_s20, %s249_s20 }
  0x68   : > { %p2593_p9 = scmp.lt.s32.totalorder %s2584_s29, %s2584_s29 }
  0x69   : > { %p2587_p1 = pnand %p2585_p5, %p3651_p12 }
  0x6a   : > { %p2594_p0 = por %p2593_p9, %p2592_p10 }
  0x6b   : > { %p2588_p6 = pneg %p2587_p1 }
  0x6d   : > { %p2595_p8 = pnand %p2594_p0, %p2588_p6 }
  0x6f   : > { %2598 = shalt.err (!%p2595_p8)
}
  0x70   : > { %s2740_s1 = smov 384   ;;  %s2741_s27 = smov 24  }
  0x71   : > { %2431 = dma.hbm_to_vmem [thread:$0]  (!%p3649_p4), %s3564_s5, 12288, %s249_s20, [#allocation9], %s2740_s1, %s2740_s1, %s2741_s27  }
  0x72   : > { %s2965_s23 = scalar_lea.hbm %s3559_s0, %s2891_s21  ;;  %s269_s14 = scalar_lea.vmem [#allocation2], %s2895_s22 }
  0x73   : > { %s276_s13 = sshll.u32 %s269_s14, 4  ;;  %s3652_s29 = sand.u32 1, %s2729_s26   ;;  %s277_s13 = int_to_ptr.vmem [resolvable:$true] %s276_s13 }
  0x74   : > { %s266_s8 = scalar_lea.sflag [#allocation3], %s3652_s29  ;;  %s2599_s24 = scalar_lea.hbm %s2965_s23, 128 }
  0x75   : > { %p2600_p9 = scmp.ne.s32.totalorder %s2965_s23, %s2599_s24  ;;  %p3653_p0 = scmp.ne.s32.totalorder %s3648_s3, 0 }
  0x76   : > { %s2604_s1 = scalar_lea.hbm %s3559_s0, 256  ;;  %p2605_p4 = scmp.lt.u32.totalorder %s2965_s23, %s3559_s0 }
  0x77   : > { %p2602_p11 = pnand %p2600_p9, %p3653_p0  ;;  %p2606_p7 = scmp.lt.u32.totalorder %s2604_s1, %s2599_s24 }
  0x78   : > { %p2608_p3 = scmp.lt.u32.totalorder %s2599_s24, %s2965_s23 }
  0x79   : > { %p2603_p13 = pneg %p2602_p11  ;;  %p2607_p2 = por %p2606_p7, %p2605_p4 }
  0x7b   : > { %p2609_p5 = por %p2608_p3, %p2607_p2 }
  0x7d   : > { %p2610_p12 = pnand %p2609_p5, %p2603_p13 }
  0x7f   : > { %2613 = shalt.err (!%p2610_p12)
}
  0x80   : > { %s2614_s18 = scalar_lea.vmem %s277_s13, 128  ;;  %s2742_s10 = smov [#allocation2]  }
  0x81   : > { %p2615_p1 = scmp.ne.s32.totalorder %s277_s13, %s2614_s18  ;;  %s2619_s15 = sshll.u32 %s2742_s10, 4  ;;  %s2620_s15 = int_to_ptr.vmem [resolvable:$false] %s2619_s15 }
  0x82   : > { %s2621_s14 = scalar_lea.vmem %s2620_s15, 256  ;;  %p2622_p8 = scmp.lt.s32.totalorder %s277_s13, %s2620_s15 }
  0x83   : > { %p2617_p6 = pnand %p2615_p1, %p3653_p0  ;;  %p2623_p9 = scmp.lt.s32.totalorder %s2621_s14, %s2614_s18 }
  0x85   : > { %p2618_p10 = pneg %p2617_p6  ;;  %p2624_p11 = por %p2623_p9, %p2622_p8 }
  0x87   : > { %p2625_p4 = pnand %p2624_p11, %p2618_p10 }
  0x89   : > { %2628 = shalt.err (!%p2625_p4)
}
  0x8a   : > { %p3654_p7 = scmp.ne.s32.totalorder %s3646_s11, 0  ;;  %s2991_s12 = scalar_lea.hbm %s3561_s2, %s2891_s21 }
  0x8b   : > { %s305_s20 = scalar_lea.vmem [#allocation7], %s2895_s22  ;;  %s2629_s27 = scalar_lea.hbm %s2991_s12, 128 }
  0x8c   : > { %2435 = dma.hbm_to_vmem [thread:$0]  (!%p3654_p7), %s2965_s23, 128, %s277_s13, %s266_s8  }
  0x8d   : > { %s312_s1 = sshll.u32 %s305_s20, 4  ;;  %p2630_p13 = scmp.ne.s32.totalorder %s2991_s12, %s2629_s27  ;;  %s313_s1 = int_to_ptr.vmem [resolvable:$true] %s312_s1 }
  0x8e   : > { %s2634_s8 = scalar_lea.hbm %s3561_s2, 256  ;;  %p2635_p5 = scmp.lt.u32.totalorder %s2991_s12, %s3561_s2 }
  0x8f   : > { %p2632_p2 = pnand %p2630_p13, %p3653_p0  ;;  %p2636_p12 = scmp.lt.u32.totalorder %s2634_s8, %s2629_s27 }
  0x90   : > { %p2638_p6 = scmp.lt.u32.totalorder %s2629_s27, %s2991_s12 }
  0x91   : > { %p2633_p3 = pneg %p2632_p2  ;;  %p2637_p1 = por %p2636_p12, %p2635_p5 }
  0x93   : > { %p2639_p10 = por %p2638_p6, %p2637_p1 }
  0x95   : > { %p2640_p8 = pnand %p2639_p10, %p2633_p3 }
  0x97   : > { %2643 = shalt.err (!%p2640_p8)
}
  0x98   : > { %s2644_s21 = scalar_lea.vmem %s313_s1, 128  ;;  %s2743_s22 = smov [#allocation7]  }
  0x99   : > { %p2645_p9 = scmp.ne.s32.totalorder %s313_s1, %s2644_s21  ;;  %s2649_s10 = sshll.u32 %s2743_s22, 4  ;;  %s2650_s10 = int_to_ptr.vmem [resolvable:$false] %s2649_s10 }
  0x9a   : > { %s2651_s15 = scalar_lea.vmem %s2650_s10, 256  ;;  %p2652_p13 = scmp.lt.s32.totalorder %s313_s1, %s2650_s10 }
  0x9b   : > { %p2647_p11 = pnand %p2645_p9, %p3653_p0  ;;  %p2653_p2 = scmp.lt.s32.totalorder %s2651_s15, %s2644_s21 }
  0x9d   : > { %p2648_p4 = pneg %p2647_p11  ;;  %p2654_p7 = por %p2653_p2, %p2652_p13 }
  0x9f   : > { %p2655_p5 = pnand %p2654_p7, %p2648_p4 }
  0xa1   : > { %2658 = shalt.err (!%p2655_p5)
}
  0xa2   : > { %p3655_p12 = scmp.ne.s32.totalorder %s3646_s11, 0  ;;  %p3656_p3 = scmp.ne.s32.totalorder %s3639_s9, 0 }
  0xa4   : > { %2441 = dma.hbm_to_vmem [thread:$0]  (!%p3655_p12), %s2991_s12, 128, %s313_s1, %s2911_s17  }
  0xa5   : > { %321 = sbr.rel (%p3656_p3) target bundleno = 1617 (0x651), region = 48 }
  0xac   : > { %s3015_s3 = sand.u32 1, %s2725_s25   ;;  %p3657_p0 = scmp.ne.s32.totalorder %s3636_s30, 0 }
  0xad   : > { %s3018_s14 = sshll.u32 %s3015_s3, 3  ;;  %s324_s24 = scalar_lea.sflag [#allocation3], %s3015_s3 }
  0xae   : > { %s327_s29 = scalar_lea.vmem [#allocation2], %s3018_s14 }
  0xaf   : > { %2704 = dma.done.wait (%p3657_p0), %s324_s24, 128  }
  0xb0   : > { %2706 = vsyncadd (%p3657_p0), %s324_s24, 4294967168  ;;  %s332_s9 = sand.u32 1, %s2809_s28   ;;  %s336_s17 = scalar_lea.vmem [#allocation5], %s3018_s14 }
  0xb1   : > { %s333_s11 = scalar_lea.sflag [#allocation6], %s332_s9 }
  0xb2   : > { %2708 = dma.done.wait (%p3657_p0), %s333_s11, 256  }
  0xb3   : > { %2710 = vsyncadd (%p3657_p0), %s333_s11, 4294967040  ;;  %s345_s12 = scalar_lea.vmem [#allocation7], %s3018_s14  ;;  %p3658_p7 = scmp.eq.s32.totalorder %s2809_s28, 0 }
  0xb5   : > { %2712 = dma.done.wait (%p3658_p7), [#allocation9], 22528   ;;  %p3659_p1 = pmov %p3658_p7 }
  0xb6   : > { %v3586_v0 = vmov 0.0   ;;  %v395_v1 = vld [vmem:[#allocation8 + $0x8] sm:$0xff]  ;;  %v400_v2 = vld [vmem:[#allocation8 + $0x30] sm:$0xff]  ;;  %v394_v3 = vld [vmem:[#allocation8] sm:$0xff]  ;;  %v3584_v53 = vmov 0.0|0.0   ;;  %vm2746_vm0 = vmmov 0  }
  0xb7   : > { %2714 = vsyncadd (%p3659_p1), [#allocation9], 4294944768  ;;  %665 = vmatprep.mubr.f32.mxu0 %v3586_v0  ;;  %736 = vmatprep.mubr.f32.mxu1 %v3586_v0  ;;  %v3039_v4 = vpack.c.bf16 %v400_v2, %v395_v1  ;;  %v399_v5 = vld [vmem:[#allocation8 + $0x28] sm:$0xff]  ;;  %v405_v6 = vld [vmem:[#allocation8 + $0x58] sm:$0xff]  ;;  %vm813_vm1 = vcmask 64512   ;;  %s1824_s16 = sshll.u32 %s2809_s28, 7 }
  0xb8   : > { %v410_v7 = vld [vmem:[#allocation8 + $0x80] sm:$0xff]  ;;  %v3041_v8 = vpack.c.bf16 %v399_v5, %v394_v3  ;;  %v404_v10 = vld [vmem:[#allocation8 + $0x50] sm:$0xff]  ;;  %v409_v11 = vld [vmem:[#allocation8 + $0x78] sm:$0xff]  ;;  %s393_s18 = scalar_lea.vmem [#allocation11], %s3018_s14  ;;  %s3515_s21 = scalar_lea.hbm %s3566_s7, %s1824_s16 }
  0xb9   : > { %v3043_v9 = vpack.c.bf16 %v410_v7, %v405_v6  ;;  %v415_v12 = vld [vmem:[#allocation8 + $0xa8] sm:$0xff]  ;;  %2030 = vmatprep.subr.bf16.mxu0 %v3039_v4  ;;  %v420_v13 = vld [vmem:[#allocation8 + $0xd0] sm:$0xff]  ;;  %v3047_v14 = vpack.c.bf16 %v409_v11, %v404_v10  ;;  %v414_v16 = vld [vmem:[#allocation8 + $0xa0] sm:$0xff]  ;;  %s1665_s8 = sshll.u32 %s393_s18, 4  ;;  %s1652_s22 = scalar_lea.sflag [#allocation4], %s3015_s3  ;;  %s3517_s8 = int_to_ptr.vmem [resolvable:$true] %s1665_s8 }
  0xba   : > { %2032 = vmatpush1.bf16.msra.mxu0 %v3041_v8  ;;  %v3050_v15 = vpack.c.bf16 %v420_v13, %v415_v12  ;;  %v419_v17 = vld [vmem:[#allocation8 + $0xc8] sm:$0xff]  ;;  %v425_v18 = vld [vmem:[#allocation8 + $0xf8] sm:$0xff]  ;;  %v430_v19 = vld [vmem:[#allocation8 + $0x120] sm:$0xff]  ;;  %s2659_s10 = scalar_lea.vmem %s3517_s8, 128  ;;  %p3748_p10 = scmp.ne.s32.totalorder %s3645_s19, 0 }
  0xbb   : > { %2034 = vmatprep.subr.bf16.mxu0 %v3043_v9  ;;  %v3053_v20 = vpack.c.bf16 %v419_v17, %v414_v16  ;;  %v3056_v21 = vpack.c.bf16 %v430_v19, %v425_v18  ;;  %v424_v22 = vld [vmem:[#allocation8 + $0xf0] sm:$0xff]  ;;  %v429_v23 = vld [vmem:[#allocation8 + $0x118] sm:$0xff]  ;;  %v435_v24 = vld [vmem:[#allocation8 + $0x148] sm:$0xff]  ;;  %p2660_p6 = scmp.ne.s32.totalorder %s3517_s8, %s2659_s10  ;;  %s2747_s28 = smov [#allocation11]  }
  0xbc   : > { %v440_v25 = vld [vmem:[#allocation8 + $0x170] sm:$0xff]  ;;  %v3059_v26 = vpack.c.bf16 %v429_v23, %v424_v22  ;;  %v434_v28 = vld [vmem:[#allocation8 + $0x140] sm:$0xff]  ;;  %v439_v29 = vld [vmem:[#allocation8 + $0x168] sm:$0xff]  ;;  %s2663_s15 = sshll.u32 %s2747_s28, 4  ;;  %s2664_s15 = int_to_ptr.vmem [resolvable:$false] %s2663_s15 }
  0xbd   : > { %v3062_v27 = vpack.c.bf16 %v440_v25, %v435_v24  ;;  %v445_v30 = vld [vmem:[#allocation8 + $0x198] sm:$0xff]  ;;  %v450_v31 = vld [vmem:[#allocation8 + $0x1c0] sm:$0xff]  ;;  %v3065_v32 = vpack.c.bf16 %v439_v29, %v434_v28  ;;  %v444_v34 = vld [vmem:[#allocation8 + $0x190] sm:$0xff]  ;;  %p2661_p8 = pnand %p2660_p6, %p3748_p10  ;;  %s2665_s14 = scalar_lea.vmem %s2664_s15, 256 }
  0xbe   : > { %2036 = vmatpush1.bf16.msra.mxu0 %v3047_v14  ;;  %v3068_v33 = vpack.c.bf16 %v450_v31, %v445_v30  ;;  %v449_v35 = vld [vmem:[#allocation8 + $0x1b8] sm:$0xff]  ;;  %v455_v36 = vld [vmem:[#allocation8 + $0x1e8] sm:$0xff]  ;;  %v460_v37 = vld [vmem:[#allocation8 + $0x210] sm:$0xff]  ;;  %p2666_p11 = scmp.lt.s32.totalorder %s3517_s8, %s2664_s15  ;;  %p2667_p4 = scmp.lt.s32.totalorder %s2665_s14, %s2659_s10 }
  0xbf   : > { %2038 = vmatprep.subr.bf16.mxu0 %v3050_v15  ;;  %v3071_v38 = vpack.c.bf16 %v449_v35, %v444_v34  ;;  %v3074_v39 = vpack.c.bf16 %v460_v37, %v455_v36  ;;  %v454_v40 = vld [vmem:[#allocation8 + $0x1e0] sm:$0xff]  ;;  %v459_v41 = vld [vmem:[#allocation8 + $0x208] sm:$0xff]  ;;  %v465_v42 = vld [vmem:[#allocation8 + $0x238] sm:$0xff]  ;;  %p2662_p9 = pneg %p2661_p8 }
  0xc0   : > { %v470_v43 = vld [vmem:[#allocation8 + $0x260] sm:$0xff]  ;;  %v3077_v44 = vpack.c.bf16 %v459_v41, %v454_v40  ;;  %v464_v46 = vld [vmem:[#allocation8 + $0x230] sm:$0xff]  ;;  %v469_v47 = vld [vmem:[#allocation8 + $0x258] sm:$0xff]  ;;  %p2668_p13 = por %p2667_p4, %p2666_p11 }
  0xc1   : > { %v3080_v45 = vpack.c.bf16 %v470_v43, %v465_v42  ;;  %v3083_v48 = vpack.c.bf16 %v469_v47, %v464_v46  ;;  %v398_v49 = vld [vmem:[#allocation8 + $0x20] sm:$0xff]  ;;  %v403_v50 = vld [vmem:[#allocation8 + $0x48] sm:$0xff]  ;;  %v3089_v51 = vld [vmem:[%s345_s12] sm:$0xff] }
  0xc2   : > { %2040 = vmatpush1.bf16.msra.mxu0 %v3053_v20  ;;  %v3091_v52 = vpack.c.bf16 %v403_v50, %v398_v49  ;;  %v408_v54 = vld [vmem:[#allocation8 + $0x70] sm:$0xff]  ;;  %v413_v55 = vld [vmem:[#allocation8 + $0x98] sm:$0xff]  ;;  %v418_v57 = vld [vmem:[#allocation8 + $0xc0] sm:$0xff]  ;;  %p2669_p2 = pnand %p2668_p13, %p2662_p9 }
  0xc3   : > { %2042 = vmatprep.subr.bf16.mxu0 %v3056_v21  ;;  %v3096_v56 = vpack.c.bf16 %v413_v55, %v408_v54  ;;  %v423_v58 = vld [vmem:[#allocation8 + $0xe8] sm:$0xff]  ;;  %v428_v60 = vld [vmem:[#allocation8 + $0x110] sm:$0xff]  ;;  %v433_v61 = vld [vmem:[#allocation8 + $0x138] sm:$0xff] }
  0xc4   : > { %v3102_v59 = vpack.c.bf16 %v423_v58, %v418_v57  ;;  %v3106_v62 = vpack.c.bf16 %v433_v61, %v428_v60  ;;  %v438_v63 = vld [vmem:[#allocation8 + $0x160] sm:$0xff]  ;;  %v443_v1 = vld [vmem:[#allocation8 + $0x188] sm:$0xff]  ;;  %v448_v3 = vld [vmem:[#allocation8 + $0x1b0] sm:$0xff] }
  0xc5   : > { %v3110_v2 = vpack.c.bf16 %v443_v1, %v438_v63  ;;  %v453_v5 = vld [vmem:[#allocation8 + $0x1d8] sm:$0xff]  ;;  %v458_v7 = vld [vmem:[#allocation8 + $0x200] sm:$0xff]  ;;  %v463_v10 = vld [vmem:[#allocation8 + $0x228] sm:$0xff] }
  0xc6   : > { %2044 = vmatpush1.bf16.msra.mxu0 %v3059_v26  ;;  %v3114_v6 = vpack.c.bf16 %v453_v5, %v448_v3  ;;  %v3118_v11 = vpack.c.bf16 %v463_v10, %v458_v7  ;;  %v468_v12 = vld [vmem:[#allocation8 + $0x250] sm:$0xff]  ;;  %v473_v13 = vld [vmem:[#allocation8 + $0x278] sm:$0xff]  ;;  %v402_v18 = vld [vmem:[#allocation8 + $0x40] sm:$0xff] }
  0xc7   : > { %2046 = vmatprep.subr.bf16.mxu0 %v3062_v27  ;;  %v3122_v16 = vpack.c.bf16 %v473_v13, %v468_v12  ;;  %v397_v17 = vld [vmem:[#allocation8 + $0x18] sm:$0xff]  ;;  %v396_v19 = vld [vmem:[#allocation8 + $0x10] sm:$0xff]  ;;  %v407_v24 = vld [vmem:[#allocation8 + $0x68] sm:$0xff] }
  0xc8   : > { %v3130_v22 = vpack.c.bf16 %v402_v18, %v397_v17  ;;  %v401_v23 = vld [vmem:[#allocation8 + $0x38] sm:$0xff]  ;;  %v412_v25 = vld [vmem:[#allocation8 + $0x90] sm:$0xff]  ;;  %v406_v30 = vld [vmem:[#allocation8 + $0x60] sm:$0xff] }
  0xc9   : > { %v3132_v28 = vpack.c.bf16 %v401_v23, %v396_v19  ;;  %v3134_v29 = vpack.c.bf16 %v412_v25, %v407_v24  ;;  %v411_v31 = vld [vmem:[#allocation8 + $0x88] sm:$0xff]  ;;  %v417_v34 = vld [vmem:[#allocation8 + $0xb8] sm:$0xff]  ;;  %v422_v35 = vld [vmem:[#allocation8 + $0xe0] sm:$0xff] }
  0xca   : > { %2048 = vmatpush1.bf16.msra.mxu0 %v3065_v32  ;;  %2062 = vmatprep.subr.bf16.mxu1 %v3130_v22  ;;  %v3138_v36 = vpack.c.bf16 %v411_v31, %v406_v30  ;;  %v3141_v37 = vpack.c.bf16 %v422_v35, %v417_v34  ;;  %v416_v40 = vld [vmem:[#allocation8 + $0xb0] sm:$0xff]  ;;  %v421_v41 = vld [vmem:[#allocation8 + $0xd8] sm:$0xff]  ;;  %v427_v42 = vld [vmem:[#allocation8 + $0x108] sm:$0xff] }
  0xcb   : > { %2050 = vmatprep.subr.bf16.mxu0 %v3068_v33  ;;  %2064 = vmatpush1.bf16.msra.mxu1 %v3132_v28  ;;  %v432_v43 = vld [vmem:[#allocation8 + $0x130] sm:$0xff]  ;;  %v3144_v46 = vpack.c.bf16 %v421_v41, %v416_v40  ;;  %v426_v49 = vld [vmem:[#allocation8 + $0x100] sm:$0xff]  ;;  %v431_v50 = vld [vmem:[#allocation8 + $0x128] sm:$0xff] }
  0xcc   : > { %2066 = vmatprep.subr.bf16.mxu1 %v3134_v29  ;;  %v3147_v47 = vpack.c.bf16 %v432_v43, %v427_v42  ;;  %v437_v54 = vld [vmem:[#allocation8 + $0x158] sm:$0xff]  ;;  %v442_v55 = vld [vmem:[#allocation8 + $0x180] sm:$0xff]  ;;  %v3150_v57 = vpack.c.bf16 %v431_v50, %v426_v49  ;;  %v436_v60 = vld [vmem:[#allocation8 + $0x150] sm:$0xff] }
  0xcd   : > { %v3153_v58 = vpack.c.bf16 %v442_v55, %v437_v54  ;;  %v441_v61 = vld [vmem:[#allocation8 + $0x178] sm:$0xff]  ;;  %v447_v63 = vld [vmem:[#allocation8 + $0x1a8] sm:$0xff]  ;;  %v452_v1 = vld [vmem:[#allocation8 + $0x1d0] sm:$0xff] }
  0xce   : > { %2052 = vmatpush1.bf16.msra.mxu0 %v3071_v38  ;;  %v3156_v3 = vpack.c.bf16 %v441_v61, %v436_v60  ;;  %v3159_v5 = vpack.c.bf16 %v452_v1, %v447_v63  ;;  %v446_v7 = vld [vmem:[#allocation8 + $0x1a0] sm:$0xff]  ;;  %v451_v10 = vld [vmem:[#allocation8 + $0x1c8] sm:$0xff]  ;;  %v457_v12 = vld [vmem:[#allocation8 + $0x1f8] sm:$0xff] }
  0xcf   : > { %2054 = vmatprep.subr.bf16.mxu0 %v3074_v39  ;;  %2068 = vmatpush1.bf16.msra.mxu1 %v3138_v36  ;;  %v462_v13 = vld [vmem:[#allocation8 + $0x220] sm:$0xff]  ;;  %v3162_v17 = vpack.c.bf16 %v451_v10, %v446_v7  ;;  %v456_v19 = vld [vmem:[#allocation8 + $0x1f0] sm:$0xff]  ;;  %v461_v23 = vld [vmem:[#allocation8 + $0x218] sm:$0xff] }
  0xd0   : > { %2070 = vmatprep.subr.bf16.mxu1 %v3141_v37  ;;  %v3165_v18 = vpack.c.bf16 %v462_v13, %v457_v12  ;;  %v467_v24 = vld [vmem:[#allocation8 + $0x248] sm:$0xff]  ;;  %v472_v25 = vld [vmem:[#allocation8 + $0x270] sm:$0xff]  ;;  %v3168_v30 = vpack.c.bf16 %v461_v23, %v456_v19  ;;  %v466_v34 = vld [vmem:[#allocation8 + $0x240] sm:$0xff] }
  0xd1   : > { %v3171_v31 = vpack.c.bf16 %v472_v25, %v467_v24  ;;  %v471_v35 = vld [vmem:[#allocation8 + $0x268] sm:$0xff]  ;;  %v478_v41 = vld [vmem:[#allocation10 + $0x20] sm:$0xff]  ;;  %v477_v50 = vld [vmem:[#allocation10 + $0x18] sm:$0xff] }
  0xd2   : > { %2056 = vmatpush1.bf16.msra.mxu0 %v3077_v44  ;;  %v475_v40 = vld [vmem:[#allocation10 + $0x8] sm:$0xff]  ;;  %v3174_v42 = vpack.c.bf16 %v471_v35, %v466_v34  ;;  %v474_v49 = vld [vmem:[#allocation10] sm:$0xff]  ;;  %v481_v54 = vld [vmem:[#allocation10 + $0x38] sm:$0xff] }
  0xd3   : > { %2058 = vmatprep.subr.bf16.mxu0 %v3080_v45  ;;  %2072 = vmatpush1.bf16.msra.mxu1 %v3144_v46  ;;  %v3177_v43 = vpack.c.bf16 %v478_v41, %v475_v40  ;;  %v484_v55 = vld [vmem:[#allocation10 + $0x50] sm:$0xff]  ;;  %v3180_v60 = vpack.c.bf16 %v477_v50, %v474_v49  ;;  %v483_v1 = vld [vmem:[#allocation10 + $0x48] sm:$0xff]  ;;  %v490_v10 = vld [vmem:[#allocation10 + $0x80] sm:$0xff] }
  0xd4   : > { %2074 = vmatprep.subr.bf16.mxu1 %v3147_v47  ;;  %v3183_v61 = vpack.c.bf16 %v484_v55, %v481_v54  ;;  %v480_v63 = vld [vmem:[#allocation10 + $0x30] sm:$0xff]  ;;  %v487_v7 = vld [vmem:[#allocation10 + $0x68] sm:$0xff]  ;;  %v486_v19 = vld [vmem:[#allocation10 + $0x60] sm:$0xff] }
  0xd5   : > { %3660 = vst [vmem:[#allocation21_spill] sm:$0xff] %v3177_v43  ;;  %3661 = vst [vmem:[#allocation22_spill] sm:$0xff] %v3180_v60  ;;  %v3187_v12 = vpack.c.bf16 %v483_v1, %v480_v63  ;;  %v3190_v13 = vpack.c.bf16 %v490_v10, %v487_v7  ;;  %v489_v23 = vld [vmem:[#allocation10 + $0x78] sm:$0xff]  ;;  %v496_v25 = vld [vmem:[#allocation10 + $0xb0] sm:$0xff] }
  0xd6   : > { %2060 = vmatpush1.bf16.msra.mxu0 %v3083_v48  ;;  %3662 = vst [vmem:[#allocation23_spill] sm:$0xff] %v3183_v61  ;;  %v493_v24 = vld [vmem:[#allocation10 + $0x98] sm:$0xff]  ;;  %v3193_v34 = vpack.c.bf16 %v489_v23, %v486_v19  ;;  %v492_v40 = vld [vmem:[#allocation10 + $0x90] sm:$0xff]  ;;  %v495_v41 = vld [vmem:[#allocation10 + $0xa8] sm:$0xff] }
  0xd7   : > { %2093 = vmatprep.subr.bf16.mxu0 %v3584_v53  ;;  %2076 = vmatpush1.bf16.msra.mxu1 %v3150_v57  ;;  %3663 = vst [vmem:[#allocation24_spill] sm:$0xff] %v3187_v12  ;;  %3664 = vst [vmem:[#allocation25_spill] sm:$0xff] %v3190_v13  ;;  %v3196_v35 = vpack.c.bf16 %v496_v25, %v493_v24  ;;  %v499_v49 = vld [vmem:[#allocation10 + $0xc8] sm:$0xff]  ;;  %v502_v50 = vld [vmem:[#allocation10 + $0xe0] sm:$0xff]  ;;  %v3199_v54 = vpack.c.bf16 %v495_v41, %v492_v40 }
  0xd8   : > { %2078 = vmatprep.subr.bf16.mxu1 %v3153_v58  ;;  %3665 = vst [vmem:[#allocation26_spill] sm:$0xff] %v3193_v34  ;;  %v3202_v55 = vpack.c.bf16 %v502_v50, %v499_v49  ;;  %v498_v63 = vld [vmem:[#allocation10 + $0xc0] sm:$0xff]  ;;  %v501_v1 = vld [vmem:[#allocation10 + $0xd8] sm:$0xff]  ;;  %v508_v10 = vld [vmem:[#allocation10 + $0x110] sm:$0xff] }
  0xd9   : > { %666 = vmatmul.mubr.f32.vlgmr.msra.gmra.mrb[0].mxu0 %v3089_v51  ;;  %3666 = vst [vmem:[#allocation27_spill] sm:$0xff] %v3196_v35  ;;  %3667 = vst [vmem:[#allocation28_spill] sm:$0xff] %v3199_v54  ;;  %v505_v7 = vld [vmem:[#allocation10 + $0xf8] sm:$0xff]  ;;  %v3205_v19 = vpack.c.bf16 %v501_v1, %v498_v63  ;;  %v504_v24 = vld [vmem:[#allocation10 + $0xf0] sm:$0xff] }
  0xda   : > { %2095 = vmatpush3.bf16.msra.mxu0 %v3091_v52  ;;  %1971 = vmatprep.mubr.msk.f32.mxu0 %vm2746_vm0, %v3586_v0  ;;  %3668 = vst [vmem:[#allocation29_spill] sm:$0xff] %v3202_v55  ;;  %v3208_v23 = vpack.c.bf16 %v508_v10, %v505_v7  ;;  %v507_v25 = vld [vmem:[#allocation10 + $0x108] sm:$0xff]  ;;  %v514_v41 = vld [vmem:[#allocation10 + $0x140] sm:$0xff]  ;;  %v517_v63 = vld [vmem:[#allocation10 + $0x158] sm:$0xff] }
  0xdb   : > { %2096 = vmatprep.subr.bf16.mxu0 %v3584_v53  ;;  %2080 = vmatpush1.bf16.msra.mxu1 %v3156_v3  ;;  %3669 = vst [vmem:[#allocation30_spill] sm:$0xff] %v3205_v19  ;;  %v511_v40 = vld [vmem:[#allocation10 + $0x128] sm:$0xff]  ;;  %v3211_v49 = vpack.c.bf16 %v507_v25, %v504_v24  ;;  %v520_v1 = vld [vmem:[#allocation10 + $0x170] sm:$0xff]  ;;  %v526_v25 = vld [vmem:[#allocation10 + $0x1a0] sm:$0xff] }
  0xdc   : > { %2082 = vmatprep.subr.bf16.mxu1 %v3159_v5  ;;  %3670 = vst [vmem:[#allocation31_spill] sm:$0xff] %v3208_v23  ;;  %v3214_v50 = vpack.c.bf16 %v514_v41, %v511_v40  ;;  %v3220_v10 = vpack.c.bf16 %v520_v1, %v517_v63  ;;  %v523_v24 = vld [vmem:[#allocation10 + $0x188] sm:$0xff] }
  0xdd   : > { %3671 = vst [vmem:[#allocation32_spill] sm:$0xff] %v3211_v49  ;;  %v3226_v41 = vpack.c.bf16 %v526_v25, %v523_v24 }
  0xde   : > { %2098 = vmatpush3.bf16.msra.mxu0 %v3096_v56  ;;  %3672 = vst [vmem:[#allocation33_spill] sm:$0xff] %v3214_v50  ;;  %3674 = vst [vmem:[#allocation35_spill] sm:$0xff] %v3220_v10 }
  0xdf   : > { %2099 = vmatprep.subr.bf16.mxu0 %v3584_v53  ;;  %2084 = vmatpush1.bf16.msra.mxu1 %v3162_v17  ;;  %3676 = vst [vmem:[#allocation37_spill] sm:$0xff] %v3226_v41 }
  0xe0   : > { %2086 = vmatprep.subr.bf16.mxu1 %v3165_v18 }
  0xe2   : > { %2101 = vmatpush3.bf16.msra.mxu0 %v3102_v59 }
  0xe3   : > { %2102 = vmatprep.subr.bf16.mxu0 %v3584_v53  ;;  %2088 = vmatpush1.bf16.msra.mxu1 %v3168_v30 }
  0xe4   : > { %2090 = vmatprep.subr.bf16.mxu1 %v3171_v31 }
  0xe6   : > { %2104 = vmatpush3.bf16.msra.mxu0 %v3106_v62 }
  0xe7   : > { %2105 = vmatprep.subr.bf16.mxu0 %v3584_v53  ;;  %2092 = vmatpush1.bf16.msra.mxu1 %v3174_v42 }
  0xe8   : > { %2118 = vmatprep.subr.bf16.mxu1 %v3177_v43  ;;  %v497_v43 = vld [vmem:[#allocation10 + $0xb8] sm:$0xff] }
  0xea   : > { %2107 = vmatpush3.bf16.msra.mxu0 %v3110_v2  ;;  %737 = vmatmul.mubr.f32.vlgmr.msra.gmra.mrb[0].mxu1 %v3089_v51 }
  0xeb   : > { %2108 = vmatprep.subr.bf16.mxu0 %v3584_v53  ;;  %2120 = vmatpush1.bf16.msra.mxu1 %v3180_v60 }
  0xec   : > { %2122 = vmatprep.subr.bf16.mxu1 %v3183_v61  ;;  %v542_v61 = vld [vmem:[#allocation10 + $0x220] sm:$0xff] }
  0xee   : > { %2110 = vmatpush3.bf16.msra.mxu0 %v3114_v6 }
  0xef   : > { %2111 = vmatprep.subr.bf16.mxu0 %v3584_v53  ;;  %2124 = vmatpush1.bf16.msra.mxu1 %v3187_v12 }
  0xf0   : > { %2126 = vmatprep.subr.bf16.mxu1 %v3190_v13  ;;  %v539_v13 = vld [vmem:[#allocation10 + $0x208] sm:$0xff] }
  0xf2   : > { %2113 = vmatpush3.bf16.msra.mxu0 %v3118_v11 }
  0xf3   : > { %2114 = vmatprep.subr.bf16.mxu0 %v3584_v53  ;;  %2128 = vmatpush1.bf16.msra.mxu1 %v3193_v34  ;;  %v510_v53 = vld [vmem:[#allocation10 + $0x120] sm:$0xff]  ;;  %v536_v34 = vld [vmem:[#allocation10 + $0x1f0] sm:$0xff] }
  0xf4   : > { %2130 = vmatprep.subr.bf16.mxu1 %v3196_v35  ;;  %v3693_v35 = vmov 0.0   ;;  %v3316_v12 = vpack.c.bf16 %v539_v13, %v536_v34 }
  0xf6   : > { %2116 = vmatpush3.bf16.msra.mxu0 %v3122_v16 }
  0xf7   : > { %1974 = vmatprep.subr.mxu0 %v3586_v0  ;;  %2132 = vmatpush1.bf16.msra.mxu1 %v3199_v54  ;;  %v533_v54 = vld [vmem:[#allocation10 + $0x1d8] sm:$0xff] }
  0xf8   : > { %2134 = vmatprep.subr.bf16.mxu1 %v3202_v55  ;;  %v516_v55 = vld [vmem:[#allocation10 + $0x150] sm:$0xff] }
  0xf9   : > { %1972 = vmatmul.mubr.f32.vlgmr.msra.gmra.mrb[2].mxu0 %v3089_v51 }
  0xfa   : > { %1976 = vmatprep.mubr.msk.f32.mxu0 %vm2746_vm0, %v3586_v0  ;;  %v513_v0 = vld [vmem:[#allocation10 + $0x138] sm:$0xff] }
  0xfb   : > { %2136 = vmatpush1.bf16.msra.mxu1 %v3205_v19  ;;  %v3217_v7 = vpack.c.bf16 %v513_v0, %v510_v53  ;;  %v519_v19 = vld [vmem:[#allocation10 + $0x168] sm:$0xff]  ;;  %v529_v0 = vld [vmem:[#allocation10 + $0x1b8] sm:$0xff]  ;;  %v532_v53 = vld [vmem:[#allocation10 + $0x1d0] sm:$0xff] }
  0xfc   : > { %2138 = vmatprep.subr.bf16.mxu1 %v3208_v23  ;;  %v3223_v40 = vpack.c.bf16 %v519_v19, %v516_v55  ;;  %v522_v23 = vld [vmem:[#allocation10 + $0x180] sm:$0xff]  ;;  %v3232_v1 = vpack.c.bf16 %v532_v53, %v529_v0  ;;  %v535_v55 = vld [vmem:[#allocation10 + $0x1e8] sm:$0xff] }
  0xfd   : > { %3673 = vst [vmem:[#allocation34_spill] sm:$0xff] %v3217_v7  ;;  %v538_v19 = vld [vmem:[#allocation10 + $0x200] sm:$0xff] }
  0xfe   : > { %3675 = vst [vmem:[#allocation36_spill] sm:$0xff] %v3223_v40  ;;  %3678 = vst [vmem:[#allocation39_spill] sm:$0xff] %v3232_v1  ;;  %v3238_v25 = vpack.c.bf16 %v538_v19, %v535_v55 }
  0xff   : > { %2140 = vmatpush1.bf16.msra.mxu1 %v3211_v49  ;;  %v525_v49 = vld [vmem:[#allocation10 + $0x198] sm:$0xff] }
 0x100   : > { %2142 = vmatprep.subr.bf16.mxu1 %v3214_v50  ;;  %v3229_v63 = vpack.c.bf16 %v525_v49, %v522_v23  ;;  %v528_v50 = vld [vmem:[#allocation10 + $0x1b0] sm:$0xff]  ;;  %3680 = vst [vmem:[#allocation41_spill] sm:$0xff] %v3238_v25  ;;  %v541_v23 = vld [vmem:[#allocation10 + $0x218] sm:$0xff] }
 0x101   : > { %v544_v49 = vld [vmem:[#allocation10 + $0x230] sm:$0xff] }
 0x102   : > { %3677 = vst [vmem:[#allocation38_spill] sm:$0xff] %v3229_v63  ;;  %v3244_v53 = vpack.c.bf16 %v544_v49, %v541_v23 }
 0x103   : > { %2144 = vmatpush1.bf16.msra.mxu1 %v3217_v7  ;;  %v531_v7 = vld [vmem:[#allocation10 + $0x1c8] sm:$0xff] }
 0x104   : > { %2146 = vmatprep.subr.bf16.mxu1 %v3220_v10  ;;  %v3235_v24 = vpack.c.bf16 %v531_v7, %v528_v50  ;;  %v534_v10 = vld [vmem:[#allocation10 + $0x1e0] sm:$0xff]  ;;  %3682 = vst [vmem:[#allocation43_spill] sm:$0xff] %v3244_v53  ;;  %v547_v50 = vld [vmem:[#allocation10 + $0x248] sm:$0xff] }
 0x105   : > { %v550_v7 = vld [vmem:[#allocation10 + $0x260] sm:$0xff] }
 0x106   : > { %3679 = vst [vmem:[#allocation40_spill] sm:$0xff] %v3235_v24  ;;  %v3250_v19 = vpack.c.bf16 %v550_v7, %v547_v50 }
 0x107   : > { %2148 = vmatpush1.bf16.msra.mxu1 %v3223_v40  ;;  %v537_v40 = vld [vmem:[#allocation10 + $0x1f8] sm:$0xff] }
 0x108   : > { %2150 = vmatprep.subr.bf16.mxu1 %v3226_v41  ;;  %v3241_v0 = vpack.c.bf16 %v537_v40, %v534_v10  ;;  %v540_v41 = vld [vmem:[#allocation10 + $0x210] sm:$0xff]  ;;  %3684 = vst [vmem:[#allocation45_spill] sm:$0xff] %v3250_v19  ;;  %v553_v10 = vld [vmem:[#allocation10 + $0x278] sm:$0xff] }
 0x109   : > { %v556_v40 = vld [vmem:[#allocation10 + $0x290] sm:$0xff] }
 0x10a   : > { %3681 = vst [vmem:[#allocation42_spill] sm:$0xff] %v3241_v0  ;;  %v3256_v49 = vpack.c.bf16 %v556_v40, %v553_v10 }
 0x10b   : > { %2152 = vmatpush1.bf16.msra.mxu1 %v3229_v63  ;;  %v543_v63 = vld [vmem:[#allocation10 + $0x228] sm:$0xff] }
 0x10c   : > { %2154 = vmatprep.subr.bf16.mxu1 %v3232_v1  ;;  %v3247_v55 = vpack.c.bf16 %v543_v63, %v540_v41  ;;  %v546_v1 = vld [vmem:[#allocation10 + $0x240] sm:$0xff]  ;;  %3686 = vst [vmem:[#allocation47_spill] sm:$0xff] %v3256_v49  ;;  %v559_v41 = vld [vmem:[#allocation10 + $0x2a8] sm:$0xff] }
 0x10d   : > { %v562_v63 = vld [vmem:[#allocation10 + $0x2c0] sm:$0xff] }
 0x10e   : > { %3683 = vst [vmem:[#allocation44_spill] sm:$0xff] %v3247_v55  ;;  %v3262_v7 = vpack.c.bf16 %v562_v63, %v559_v41  ;;  %v524_v41 = vld [vmem:[#allocation10 + $0x190] sm:$0xff]  ;;  %v527_v63 = vld [vmem:[#allocation10 + $0x1a8] sm:$0xff] }
 0x10f   : > { %2156 = vmatpush1.bf16.msra.mxu1 %v3235_v24  ;;  %v549_v24 = vld [vmem:[#allocation10 + $0x258] sm:$0xff] }
 0x110   : > { %2158 = vmatprep.subr.bf16.mxu1 %v3238_v25  ;;  %v3253_v23 = vpack.c.bf16 %v549_v24, %v546_v1  ;;  %v552_v25 = vld [vmem:[#allocation10 + $0x270] sm:$0xff]  ;;  %3688 = vst [vmem:[#allocation49_spill] sm:$0xff] %v3262_v7  ;;  %v576_v24 = vlaneseq }
 0x112   : > { %3685 = vst [vmem:[#allocation46_spill] sm:$0xff] %v3253_v23  ;;  %v3269_v10 = vshrl.u32 %v576_v24, 7 }
 0x113   : > { %2160 = vmatpush1.bf16.msra.mxu1 %v3241_v0  ;;  %v555_v0 = vld [vmem:[#allocation10 + $0x288] sm:$0xff] }
 0x114   : > { %2162 = vmatprep.subr.bf16.mxu1 %v3244_v53  ;;  %v3259_v50 = vpack.c.bf16 %v555_v0, %v552_v25  ;;  %v558_v53 = vld [vmem:[#allocation10 + $0x2a0] sm:$0xff]  ;;  %v3608_v25 = vsub.s32 0, %v3269_v10  ;;  %v3275_v0 = vld [vmem:[%s3563_s4] sm:$0x1f]  ;;  %v3611_v40 = vsub.s32 1, %v3269_v10 }
 0x116   : > { %3687 = vst [vmem:[#allocation48_spill] sm:$0xff] %v3259_v50 }
 0x117   : > { %2164 = vmatpush1.bf16.msra.mxu1 %v3247_v55  ;;  %v561_v55 = vld [vmem:[#allocation10 + $0x2b8] sm:$0xff] }
 0x118   : > { %2166 = vmatprep.subr.bf16.mxu1 %v3250_v19  ;;  %v3265_v1 = vpack.c.bf16 %v561_v55, %v558_v53  ;;  %v3281_v53 = vrot.slane %v3275_v0, %v3608_v25  ;;  %v3286_v55 = vrot.slane %v3275_v0, %v3611_v40  ;;  %v3294_v25 = vpack.c.bf16 %v527_v63, %v524_v41  ;;  %v479_v19 = vld [vmem:[#allocation10 + $0x28] sm:$0xff]  ;;  %v530_v40 = vld [vmem:[#allocation10 + $0x1c0] sm:$0xff]  ;;  %v485_v63 = vld [vmem:[#allocation10 + $0x58] sm:$0xff] }
 0x119   : > { %v3308_v41 = vpack.c.bf16 %v533_v54, %v530_v40  ;;  %v545_v54 = vld [vmem:[#allocation10 + $0x238] sm:$0xff] }
 0x11a   : > { %3689 = vst [vmem:[#allocation50_spill] sm:$0xff] %v3265_v1  ;;  %3690 = vst [vmem:[#allocation51_spill] sm:$0xff] %v3281_v53  ;;  %v3322_v60 = vpack.c.bf16 %v545_v54, %v542_v61 }
 0x11b   : > { %2168 = vmatpush1.bf16.msra.mxu1 %v3253_v23  ;;  %3691 = vst [vmem:[#allocation52_spill] sm:$0xff] %v3286_v55  ;;  %v476_v23 = vld [vmem:[#allocation10 + $0x10] sm:$0xff] }
 0x11c   : > { %2170 = vmatprep.subr.bf16.mxu1 %v3256_v49  ;;  %3696 = vst [vmem:[#allocation56_spill] sm:$0xff] %v3322_v60 }
 0x11f   : > { %2172 = vmatpush1.bf16.msra.mxu1 %v3259_v50  ;;  %v3291_v50 = vld [vmem:[%s327_s29] sm:$0xff] }
 0x120   : > { %2174 = vmatprep.subr.bf16.mxu1 %v3262_v7  ;;  %3692 = vst [vmem:[#allocation53_spill] sm:$0xff] %v3291_v50 }
 0x123   : > { %2176 = vmatpush1.bf16.msra.mxu1 %v3265_v1 }
 0x1ac   : > { %v667_v24 = vpop.f32.mrb[0].mxu0 }
 0x1ad   : > { %v668_v1 = vadd.f32 %v667_v24, %v3281_v53  ;;  %v669_v7 = vpop.f32.mrb[1].mxu0  ;;  %v3303_v24 = vld [vmem:[%s336_s17] sm:$0xff] }
 0x1ae   : > { %v670_v49 = vadd.f32 %v669_v7, %v3286_v55  ;;  %3694 = vst [vmem:[#allocation54_spill] sm:$0xff] %v3303_v24  ;;  %v3305_v7 = vpack.c.bf16 %v479_v19, %v476_v23  ;;  %v488_v19 = vld [vmem:[#allocation10 + $0x70] sm:$0xff]  ;;  %v491_v23 = vld [vmem:[#allocation10 + $0x88] sm:$0xff]  ;;  %v506_v53 = vld [vmem:[#allocation10 + $0x100] sm:$0xff] }
 0x1af   : > { %1975 = vmatpush3.msra.mxu0 %v668_v1  ;;  %v482_v1 = vld [vmem:[#allocation10 + $0x40] sm:$0xff]  ;;  %v3319_v40 = vpack.c.bf16 %v491_v23, %v488_v19  ;;  %v503_v55 = vld [vmem:[#allocation10 + $0xe8] sm:$0xff]  ;;  %v557_v23 = vld [vmem:[#allocation10 + $0x298] sm:$0xff] }
 0x1b0   : > { %1977 = vmatmul.mubr.msk.f32.vlgmr.msra.gmra.mrb[4].mxu0 %vm813_vm1, %v3291_v50  ;;  %1979 = vmatprep.subr.mxu0 %v3693_v35  ;;  %v500_v50 = vld [vmem:[#allocation10 + $0xd0] sm:$0xff]  ;;  %v554_v19 = vld [vmem:[#allocation10 + $0x280] sm:$0xff] }
 0x1b1   : > { %1980 = vmatpush3.msra.mxu0 %v670_v49  ;;  %1981 = vmatprep.mubr.msk.f32.mxu0 %vm2746_vm0, %v3693_v35  ;;  %v3313_v49 = vpack.c.bf16 %v485_v63, %v482_v1  ;;  %3695 = vst [vmem:[#allocation55_spill] sm:$0xff] %v3319_v40  ;;  %v548_v1 = vld [vmem:[#allocation10 + $0x250] sm:$0xff]  ;;  %v551_v63 = vld [vmem:[#allocation10 + $0x268] sm:$0xff]  ;;  %v3331_v61 = vpack.c.bf16 %v503_v55, %v500_v50 }
 0x1b2   : > { %2182 = vmatprep.subr.bf16.mxu0 %v3294_v25  ;;  %v3328_v34 = vpack.c.bf16 %v551_v63, %v548_v1  ;;  %v3334_v54 = vpack.c.bf16 %v557_v23, %v554_v19  ;;  %v565_v23 = vld [vmem:[#allocation10 + $0x2d8] sm:$0xff] }
 0x1b3   : > { %3699 = vst [vmem:[#allocation59_spill] sm:$0xff] %v3331_v61 }
 0x1b4   : > { %1982 = vmatmul.mubr.msk.f32.vlgmr.msra.gmra.mrb[6].mxu0 %vm813_vm1, %v3303_v24  ;;  %v494_v24 = vld [vmem:[#allocation10 + $0xa0] sm:$0xff]  ;;  %3698 = vst [vmem:[#allocation58_spill] sm:$0xff] %v3328_v34  ;;  %3700 = vst [vmem:[#allocation60_spill] sm:$0xff] %v3334_v54 }
 0x1b5   : > { %2184 = vmatpush3.bf16.msra.mxu0 %v3305_v7  ;;  %v3325_v13 = vpack.c.bf16 %v497_v43, %v494_v24  ;;  %v560_v43 = vld [vmem:[#allocation10 + $0x2b0] sm:$0xff]  ;;  %v563_v24 = vld [vmem:[#allocation10 + $0x2c8] sm:$0xff] }
 0x1b6   : > { %2186 = vmatprep.subr.bf16.mxu0 %v3308_v41  ;;  %v3340_v63 = vpack.c.bf16 %v563_v24, %v560_v43  ;;  %v569_v43 = vld [vmem:[#allocation10 + $0x2f8] sm:$0xff]  ;;  %v564_v24 = vld [vmem:[#allocation10 + $0x2d0] sm:$0xff] }
 0x1b7   : > { %3697 = vst [vmem:[#allocation57_spill] sm:$0xff] %v3325_v13 }
 0x1b8   : > { %3702 = vst [vmem:[#allocation62_spill] sm:$0xff] %v3340_v63 }
 0x1b9   : > { %2188 = vmatpush3.bf16.msra.mxu0 %v3313_v49 }
 0x1ba   : > { %2190 = vmatprep.subr.bf16.mxu0 %v3316_v12 }
 0x1bd   : > { %2192 = vmatpush3.bf16.msra.mxu0 %v3319_v40  ;;  %v509_v40 = vld [vmem:[#allocation10 + $0x118] sm:$0xff] }
 0x1be   : > { %2194 = vmatprep.subr.bf16.mxu0 %v3322_v60  ;;  %v3337_v1 = vpack.c.bf16 %v509_v40, %v506_v53  ;;  %v512_v60 = vld [vmem:[#allocation10 + $0x130] sm:$0xff]  ;;  %v566_v40 = vld [vmem:[#allocation10 + $0x2e0] sm:$0xff] }
 0x1bf   : > { %v568_v53 = vld [vmem:[#allocation10 + $0x2f0] sm:$0xff] }
 0x1c0   : > { %3701 = vst [vmem:[#allocation61_spill] sm:$0xff] %v3337_v1 }
 0x1c1   : > { %2196 = vmatpush3.bf16.msra.mxu0 %v3325_v13  ;;  %v515_v13 = vld [vmem:[#allocation10 + $0x148] sm:$0xff] }
 0x1c2   : > { %2198 = vmatprep.subr.bf16.mxu0 %v3328_v34  ;;  %v3343_v50 = vpack.c.bf16 %v515_v13, %v512_v60  ;;  %v3351_v34 = vpack.c.bf16 %v569_v43, %v566_v40  ;;  %v518_v60 = vld [vmem:[#allocation10 + $0x160] sm:$0xff]  ;;  %v521_v13 = vld [vmem:[#allocation10 + $0x178] sm:$0xff] }
 0x1c5   : > { %2200 = vmatpush3.bf16.msra.mxu0 %v3331_v61  ;;  %v3349_v61 = vpack.c.bf16 %v568_v53, %v565_v23 }
 0x1c6   : > { %2202 = vmatprep.subr.bf16.mxu0 %v3334_v54  ;;  %v567_v54 = vld [vmem:[#allocation10 + $0x2e8] sm:$0xff] }
 0x1c7   : > { %2178 = vmatprep.subr.bf16.mxu1 %v3349_v61 }
 0x1c9   : > { %2204 = vmatpush3.bf16.msra.mxu0 %v3337_v1  ;;  %v3353_v1 = vpack.c.bf16 %v567_v54, %v564_v24 }
 0x1ca   : > { %2206 = vmatprep.subr.bf16.mxu0 %v3340_v63  ;;  %v3356_v63 = vpack.c.bf16 %v521_v13, %v518_v60  ;;  %v3720_v13 = vld [vmem:[#allocation23_spill] sm:$0xff] }
 0x1cb   : > { %2180 = vmatpush1.bf16.msra.mxu1 %v3353_v1 }
 0x1cc   : > { %v3346_v55 = vpop.f32.mrb[2].mxu0  ;;  %2246 = vmatprep.subr.bf16.mxu1 %v3130_v22 }
 0x1cd   : > { %v1973_v19 = vpop.f32.mrb[3].mxu0  ;;  %2208 = vmatpush3.bf16.msra.mxu0 %v3343_v50 }
 0x1ce   : > { %2210 = vmatprep.subr.bf16.mxu0 %v3351_v34 }
 0x1d1   : > { %2212 = vmatpush3.bf16.msra.mxu0 %v3356_v63 }
 0x1d2   : > { %2214 = vmatprep.subr.bf16.mxu0 %v3039_v4  ;;  %v3703_v4 = vmov 0.0|0.0  }
 0x283   : > { %v883_v19 = vpop.f32.mrb[4].mxu0 }
 0x284   : > { %v1978_v23 = vpop.f32.mrb[5].mxu0 }
 0x285   : > { %v3722_v23 = vld [vmem:[#allocation25_spill] sm:$0xff] }
 0x287   : > { %v956_v54 = vpop.f32.mrb[6].mxu0 }
 0x288   : > { %v1983_v53 = vpop.f32.mrb[7].mxu0  ;;  %1040 = vmatprep.mubr.f32.mxu1 %v956_v54  ;;  %1111 = vmatprep.mubr.f32.mxu0 %v956_v54  ;;  %v3723_v54 = vld [vmem:[#allocation26_spill] sm:$0xff] }
 0x289   : > { %1041 = vmatmul.mubr.f32.vlgmr.msra.gmra.mrb[0].mxu1 %v883_v19  ;;  %1112 = vmatmul.mubr.f32.vlgmr.msra.gmra.mrb[8].mxu0 %v883_v19  ;;  %v3721_v19 = vld [vmem:[#allocation24_spill] sm:$0xff]  ;;  %v3724_v53 = vld [vmem:[#allocation27_spill] sm:$0xff] }
 0x28a   : > { %2216 = vmatpush1.bf16.msra.mxu0 %v3041_v8  ;;  %2248 = vmatpush1.bf16.msra.mxu1 %v3132_v28  ;;  %v586_v8 = vsub.s32 2, %v3269_v10 }
 0x28b   : > { %2218 = vmatprep.subr.bf16.mxu0 %v3043_v9  ;;  %2250 = vmatprep.subr.bf16.mxu1 %v3134_v29  ;;  %v573_v9 = vld [vmem:[%s3565_s6] sm:$0x7] }
 0x28c   : > { %1201 = vmatprep.mubr.f32.mxu0 %v3693_v35  ;;  %1272 = vmatprep.mubr.f32.mxu1 %v3693_v35 }
 0x28e   : > { %2220 = vmatpush1.bf16.msra.mxu0 %v3047_v14  ;;  %2252 = vmatpush1.bf16.msra.mxu1 %v3138_v36  ;;  %v587_v14 = vrot.slane %v3275_v0, %v586_v8 }
 0x28f   : > { %2222 = vmatprep.subr.bf16.mxu0 %v3050_v15  ;;  %2254 = vmatprep.subr.bf16.mxu1 %v3141_v37  ;;  %v3704_v15 = vsub.s32 0, %v3269_v10 }
 0x292   : > { %2224 = vmatpush1.bf16.msra.mxu0 %v3053_v20  ;;  %2256 = vmatpush1.bf16.msra.mxu1 %v3144_v46  ;;  %v964_v20 = vrot.slane %v573_v9, %v3704_v15  ;;  %v3730_v15 = vld [vmem:[#allocation33_spill] sm:$0xff] }
 0x293   : > { %2226 = vmatprep.subr.bf16.mxu0 %v3056_v21  ;;  %2258 = vmatprep.subr.bf16.mxu1 %v3147_v47 }
 0x294   : > { %v3404_v21 = vadd.f32 %v964_v20, %v587_v14  ;;  %v3729_v14 = vld [vmem:[#allocation32_spill] sm:$0xff] }
 0x296   : > { %2228 = vmatpush1.bf16.msra.mxu0 %v3059_v26  ;;  %2260 = vmatpush1.bf16.msra.mxu1 %v3150_v57  ;;  %v590_v26 = vsub.s32 3, %v3269_v10  ;;  %v594_v57 = vsub.s32 4, %v3269_v10 }
 0x297   : > { %2230 = vmatprep.subr.bf16.mxu0 %v3062_v27  ;;  %2262 = vmatprep.subr.bf16.mxu1 %v3153_v58 }
 0x298   : > { %v3416_v58 = vrot.slane %v3275_v0, %v594_v57  ;;  %v3745_v57 = vld [vmem:[#allocation48_spill] sm:$0xff] }
 0x29a   : > { %2232 = vmatpush1.bf16.msra.mxu0 %v3065_v32  ;;  %2264 = vmatpush1.bf16.msra.mxu1 %v3156_v3  ;;  %v3418_v3 = vrot.slane %v573_v9, %v586_v8  ;;  %v3727_v8 = vld [vmem:[#allocation30_spill] sm:$0xff] }
 0x29b   : > { %2234 = vmatprep.subr.bf16.mxu0 %v3068_v33  ;;  %2266 = vmatprep.subr.bf16.mxu1 %v3159_v5 }
 0x29e   : > { %2236 = vmatpush1.bf16.msra.mxu0 %v3071_v38  ;;  %2268 = vmatpush1.bf16.msra.mxu1 %v3162_v17  ;;  %v591_v38 = vrot.slane %v3275_v0, %v590_v26  ;;  %v810_v17 = vadd.f32 %v3346_v55, %v3416_v58  ;;  %v3716_v55 = vld [vmem:[#allocation53_spill] sm:$0xff] }
 0x29f   : > { %2238 = vmatprep.subr.bf16.mxu0 %v3074_v39  ;;  %2270 = vmatprep.subr.bf16.mxu1 %v3165_v18  ;;  %v3705_v39 = vsub.s32 1, %v3269_v10 }
 0x2a2   : > { %2240 = vmatpush1.bf16.msra.mxu0 %v3077_v44  ;;  %2272 = vmatpush1.bf16.msra.mxu1 %v3168_v30  ;;  %v968_v44 = vrot.slane %v573_v9, %v3705_v39  ;;  %v3728_v9 = vld [vmem:[#allocation31_spill] sm:$0xff]  ;;  %v3735_v39 = vld [vmem:[#allocation38_spill] sm:$0xff] }
 0x2a3   : > { %2242 = vmatprep.subr.bf16.mxu0 %v3080_v45  ;;  %2274 = vmatprep.subr.bf16.mxu1 %v3171_v31 }
 0x2a4   : > { %v3411_v29 = vadd.f32 %v968_v44, %v591_v38  ;;  %v3734_v38 = vld [vmem:[#allocation37_spill] sm:$0xff]  ;;  %v3736_v44 = vld [vmem:[#allocation39_spill] sm:$0xff] }
 0x2a6   : > { %2244 = vmatpush1.bf16.msra.mxu0 %v3083_v48  ;;  %2276 = vmatpush1.bf16.msra.mxu1 %v3174_v42 }
 0x2a7   : > { %2277 = vmatprep.subr.bf16.mxu0 %v3703_v4  ;;  %2019 = vmatprep.subr.mxu1 %v3693_v35 }
 0x35c   : > { %v1042_v27 = vpop.f32.mrb[0].mxu1  ;;  %v1880_v32 = vpop.f32.mrb[8].mxu0 }
 0x35d   : > { %v2398_v33 = vadd.f32 %v3404_v21, %v1042_v27  ;;  %v1044_v45 = vpop.f32.mrb[1].mxu1  ;;  %v1881_v48 = vpop.f32.mrb[9].mxu0  ;;  %v3731_v27 = vld [vmem:[#allocation34_spill] sm:$0xff] }
 0x35e   : > { %v1882_v22 = vadd.f32 %v1881_v48, %v1880_v32  ;;  %v2400_v36 = vadd.f32 %v3411_v29, %v1044_v45  ;;  %v3732_v32 = vld [vmem:[#allocation35_spill] sm:$0xff]  ;;  %v3737_v45 = vld [vmem:[#allocation40_spill] sm:$0xff]  ;;  %v3738_v48 = vld [vmem:[#allocation41_spill] sm:$0xff] }
 0x35f   : > { %v1817_v28 = vmul.f32 -1.442695, %v2398_v33  ;;  %v3733_v33 = vld [vmem:[#allocation36_spill] sm:$0xff] }
 0x360   : > { %v1818_v37 = vmul.f32 -1.442695, %v2400_v36  ;;  %v1114_v30 = vadd.f32 %v1882_v22, %v3418_v3  ;;  %v3739_v22 = vld [vmem:[#allocation42_spill] sm:$0xff]  ;;  %v3741_v36 = vld [vmem:[#allocation44_spill] sm:$0xff] }
 0x361   : > { %2493 = vpow2.f32 %v1817_v28  ;;  %v3740_v28 = vld [vmem:[#allocation43_spill] sm:$0xff] }
 0x362   : > { %2495 = vpow2.f32 %v1818_v37  ;;  %v3742_v37 = vld [vmem:[#allocation45_spill] sm:$0xff] }
 0x36b   : > { %v2494_v46 = vpop.eup %2493 }
 0x36c   : > { %v1125_v47 = vadd.f32 1.0, %v2494_v46  ;;  %v2496_v5 = vpop.eup %2495  ;;  %v3743_v46 = vld [vmem:[#allocation46_spill] sm:$0xff] }
 0x36d   : > { %v1126_v42 = vadd.f32 1.0, %v2496_v5  ;;  %v3746_v5 = vld [vmem:[#allocation49_spill] sm:$0xff] }
 0x36e   : > { %2497 = vrcp.f32 %v1125_v47  ;;  %v3744_v47 = vld [vmem:[#allocation47_spill] sm:$0xff] }
 0x378   : > { %v2498_v18 = vpop.eup %2497 }
 0x379   : > { %v1131_v31 = vmul.f32 %v2498_v18, %v810_v17  ;;  %v3747_v17 = vld [vmem:[#allocation50_spill] sm:$0xff] }
 0x37b   : > { %v1132_v40 = vadd.f32 %v1131_v31, %v1114_v30 }
 0x37d   : > { %2499 = vtanh.f32 %v1132_v40 }
 0x37e   : > { %2501 = vrcp.f32 %v1126_v42 }
 0x387   : > { %v2500_v43 = vpop.eup %2499 }
 0x388   : > { %v1134_v10 = vsub.f32 %v3089_v51, %v2500_v43  ;;  %v2502_v24 = vpop.eup %2501  ;;  %v3706_v51 = vld [vmem:[#allocation55_spill] sm:$0xff] }
 0x38a   : > { %v1135_v0 = vmul.f32 %v2502_v24, %v1134_v10 }
 0x38c   : > { %v3424_v60 = vadd.f32 %v2500_v43, %v1135_v0 }
 0x38e   : > { %1202 = vmatmul.mubr.f32.vlgmr.msra.gmra.mrb[10].mxu0 %v3424_v60  ;;  %1273 = vmatmul.mubr.f32.vlgmr.msra.gmra.mrb[2].mxu1 %v3424_v60 }
 0x38f   : > { %2279 = vmatpush3.bf16.msra.mxu0 %v3091_v52  ;;  %2016 = vmatprep.mubr.msk.f32.mxu0 %vm2746_vm0, %v3693_v35  ;;  %v3707_v52 = vld [vmem:[#allocation56_spill] sm:$0xff] }
 0x390   : > { %2280 = vmatprep.subr.bf16.mxu0 %v3703_v4  ;;  %2021 = vmatprep.mubr.msk.f32.mxu1 %vm2746_vm0, %v3693_v35 }
 0x393   : > { %2282 = vmatpush3.bf16.msra.mxu0 %v3096_v56  ;;  %v3708_v56 = vld [vmem:[#allocation57_spill] sm:$0xff] }
 0x394   : > { %2283 = vmatprep.subr.bf16.mxu0 %v3703_v4 }
 0x397   : > { %2285 = vmatpush3.bf16.msra.mxu0 %v3102_v59  ;;  %v3709_v59 = vld [vmem:[#allocation58_spill] sm:$0xff] }
 0x398   : > { %2286 = vmatprep.subr.bf16.mxu0 %v3703_v4 }
 0x39b   : > { %2288 = vmatpush3.bf16.msra.mxu0 %v3106_v62  ;;  %v3710_v62 = vld [vmem:[#allocation59_spill] sm:$0xff] }
 0x39c   : > { %2289 = vmatprep.subr.bf16.mxu0 %v3703_v4 }
 0x39f   : > { %2291 = vmatpush3.bf16.msra.mxu0 %v3110_v2  ;;  %v3711_v2 = vld [vmem:[#allocation60_spill] sm:$0xff] }
 0x3a0   : > { %2292 = vmatprep.subr.bf16.mxu0 %v3703_v4 }
 0x3a3   : > { %2294 = vmatpush3.bf16.msra.mxu0 %v3114_v6  ;;  %v3712_v6 = vld [vmem:[#allocation61_spill] sm:$0xff] }
 0x3a4   : > { %2295 = vmatprep.subr.bf16.mxu0 %v3703_v4 }
 0x3a7   : > { %2297 = vmatpush3.bf16.msra.mxu0 %v3118_v11  ;;  %v3713_v11 = vld [vmem:[#allocation62_spill] sm:$0xff] }
 0x3a8   : > { %2298 = vmatprep.subr.bf16.mxu0 %v3703_v4  ;;  %v3725_v4 = vld [vmem:[#allocation28_spill] sm:$0xff] }
 0x3ab   : > { %2300 = vmatpush3.bf16.msra.mxu0 %v3122_v16 }
 0x3ac   : > { %2366 = vmatprep.subr.bf16.mxu0 %v3294_v25 }
 0x3ae   : > { %2017 = vmatmul.mubr.f32.vlgmr.msra.gmra.mrb[12].mxu0 %v3424_v60 }
 0x3af   : > { %2368 = vmatpush3.bf16.msra.mxu0 %v3305_v7 }
 0x3b0   : > { %2370 = vmatprep.subr.bf16.mxu0 %v3308_v41  ;;  %v3715_v41 = vld [vmem:[#allocation52_spill] sm:$0xff] }
 0x3b3   : > { %2372 = vmatpush3.bf16.msra.mxu0 %v3313_v49 }
 0x3b4   : > { %2374 = vmatprep.subr.bf16.mxu0 %v3316_v12  ;;  %v3714_v12 = vld [vmem:[#allocation51_spill] sm:$0xff] }
 0x3b7   : > { %2376 = vmatpush3.bf16.msra.mxu0 %v3706_v51 }
 0x3b8   : > { %2378 = vmatprep.subr.bf16.mxu0 %v3707_v52 }
 0x3bb   : > { %2380 = vmatpush3.bf16.msra.mxu0 %v3708_v56 }
 0x3bc   : > { %2382 = vmatprep.subr.bf16.mxu0 %v3709_v59 }
 0x3bf   : > { %2384 = vmatpush3.bf16.msra.mxu0 %v3710_v62 }
 0x3c0   : > { %2386 = vmatprep.subr.bf16.mxu0 %v3711_v2 }
 0x3c3   : > { %2388 = vmatpush3.bf16.msra.mxu0 %v3712_v6 }
 0x3c4   : > { %2390 = vmatprep.subr.bf16.mxu0 %v3713_v11 }
 0x3c7   : > { %2392 = vmatpush3.bf16.msra.mxu0 %v3343_v50  ;;  %v3717_v50 = vld [vmem:[#allocation21_spill] sm:$0xff] }
 0x3c8   : > { %2394 = vmatprep.subr.bf16.mxu0 %v3351_v34  ;;  %v3718_v34 = vld [vmem:[#allocation54_spill] sm:$0xff] }
 0x3cb   : > { %2396 = vmatpush3.bf16.msra.mxu0 %v3356_v63  ;;  %v3719_v63 = vld [vmem:[#allocation22_spill] sm:$0xff] }
 0x461   : > { %v1203_v16 = vpop.f32.mrb[10].mxu0 }
 0x462   : > { %v1204_v25 = vadd.f32 %v1203_v16, %v3714_v12  ;;  %v1205_v7 = vpop.f32.mrb[11].mxu0 }
 0x463   : > { %v1206_v49 = vadd.f32 %v1205_v7, %v3715_v41 }
 0x464   : > { %2020 = vmatpush3.msra.mxu1 %v1204_v25 }
 0x465   : > { %2022 = vmatmul.mubr.msk.f32.vlgmr.msra.gmra.mrb[4].mxu1 %vm813_vm1, %v3716_v55  ;;  %2024 = vmatprep.subr.mxu1 %v3693_v35 }
 0x466   : > { %2025 = vmatpush3.msra.mxu1 %v1206_v49  ;;  %2026 = vmatprep.mubr.msk.f32.mxu1 %vm2746_vm0, %v3693_v35  ;;  %v3726_v35 = vld [vmem:[#allocation29_spill] sm:$0xff] }
 0x467   : > { %2302 = vmatprep.subr.bf16.mxu1 %v3717_v50 }
 0x469   : > { %2027 = vmatmul.mubr.msk.f32.vlgmr.msra.gmra.mrb[6].mxu1 %vm813_vm1, %v3718_v34 }
 0x46a   : > { %2304 = vmatpush1.bf16.msra.mxu1 %v3719_v63 }
 0x46b   : > { %2306 = vmatprep.subr.bf16.mxu1 %v3720_v13 }
 0x46e   : > { %2308 = vmatpush1.bf16.msra.mxu1 %v3721_v19 }
 0x46f   : > { %2310 = vmatprep.subr.bf16.mxu1 %v3722_v23 }
 0x472   : > { %2312 = vmatpush1.bf16.msra.mxu1 %v3723_v54 }
 0x473   : > { %2314 = vmatprep.subr.bf16.mxu1 %v3724_v53 }
 0x476   : > { %2316 = vmatpush1.bf16.msra.mxu1 %v3725_v4 }
 0x477   : > { %2318 = vmatprep.subr.bf16.mxu1 %v3726_v35 }
 0x47a   : > { %2320 = vmatpush1.bf16.msra.mxu1 %v3727_v8 }
 0x47b   : > { %2322 = vmatprep.subr.bf16.mxu1 %v3728_v9 }
 0x47e   : > { %2324 = vmatpush1.bf16.msra.mxu1 %v3729_v14 }
 0x47f   : > { %2326 = vmatprep.subr.bf16.mxu1 %v3730_v15 }
 0x481   : > { %v1345_v20 = vpop.f32.mrb[12].mxu0 }
 0x482   : > { %v2018_v26 = vpop.f32.mrb[13].mxu0  ;;  %2328 = vmatpush1.bf16.msra.mxu1 %v3731_v27  ;;  %v1346_v2 = vadd.f32 %v1345_v20, %v3416_v58 }
 0x483   : > { %2330 = vmatprep.subr.bf16.mxu1 %v3732_v32 }
 0x486   : > { %2332 = vmatpush1.bf16.msra.mxu1 %v3733_v33 }
 0x487   : > { %2334 = vmatprep.subr.bf16.mxu1 %v3734_v38 }
 0x48a   : > { %2336 = vmatpush1.bf16.msra.mxu1 %v3735_v39 }
 0x48b   : > { %2338 = vmatprep.subr.bf16.mxu1 %v3736_v44 }
 0x48e   : > { %2340 = vmatpush1.bf16.msra.mxu1 %v3737_v45 }
 0x48f   : > { %2342 = vmatprep.subr.bf16.mxu1 %v3738_v48 }
 0x492   : > { %2344 = vmatpush1.bf16.msra.mxu1 %v3739_v22 }
 0x493   : > { %2346 = vmatprep.subr.bf16.mxu1 %v3740_v28 }
 0x496   : > { %2348 = vmatpush1.bf16.msra.mxu1 %v3741_v36 }
 0x497   : > { %2350 = vmatprep.subr.bf16.mxu1 %v3742_v37 }
 0x49a   : > { %2352 = vmatpush1.bf16.msra.mxu1 %v3743_v46 }
 0x49b   : > { %2354 = vmatprep.subr.bf16.mxu1 %v3744_v47 }
 0x49e   : > { %2356 = vmatpush1.bf16.msra.mxu1 %v3745_v57 }
 0x49f   : > { %2358 = vmatprep.subr.bf16.mxu1 %v3746_v5 }
 0x4a2   : > { %2360 = vmatpush1.bf16.msra.mxu1 %v3747_v17 }
 0x4a3   : > { %2362 = vmatprep.subr.bf16.mxu1 %v3349_v61 }
 0x4a6   : > { %2364 = vmatpush1.bf16.msra.mxu1 %v3353_v1 }
 0x538   : > { %v1415_v18 = vpop.f32.mrb[4].mxu1 }
 0x539   : > { %v2023_v30 = vpop.f32.mrb[5].mxu1 }
 0x53c   : > { %v1485_v31 = vpop.f32.mrb[6].mxu1 }
 0x53d   : > { %1553 = vmatprep.mubr.f32.mxu1 %v1485_v31  ;;  %1624 = vmatprep.mubr.f32.mxu0 %v1485_v31  ;;  %v2028_v42 = vpop.f32.mrb[7].mxu1 }
 0x53e   : > { %1554 = vmatmul.mubr.f32.vlgmr.msra.gmra.mrb[2].mxu1 %v1415_v18  ;;  %1625 = vmatmul.mubr.f32.vlgmr.msra.gmra.mrb[14].mxu0 %v1415_v18 }
 0x611   : > { %v1555_v40 = vpop.f32.mrb[2].mxu1  ;;  %v1936_v43 = vpop.f32.mrb[14].mxu0 }
 0x612   : > { %v2402_v10 = vadd.f32 %v3404_v21, %v1555_v40  ;;  %v1557_v24 = vpop.f32.mrb[3].mxu1  ;;  %v1937_v0 = vpop.f32.mrb[15].mxu0 }
 0x613   : > { %v1938_v51 = vadd.f32 %v1937_v0, %v1936_v43  ;;  %v2404_v61 = vadd.f32 %v3411_v29, %v1557_v24 }
 0x614   : > { %v1821_v52 = vmul.f32 -1.442695, %v2402_v10 }
 0x615   : > { %v1822_v1 = vmul.f32 -1.442695, %v2404_v61  ;;  %v1627_v21 = vadd.f32 %v1938_v51, %v3418_v3 }
 0x616   : > { %2503 = vpow2.f32 %v1821_v52 }
 0x617   : > { %2505 = vpow2.f32 %v1822_v1 }
 0x620   : > { %v2504_v56 = vpop.eup %2503 }
 0x621   : > { %v1638_v59 = vadd.f32 1.0, %v2504_v56  ;;  %v2506_v62 = vpop.eup %2505 }
 0x622   : > { %v1639_v16 = vadd.f32 1.0, %v2506_v62 }
 0x623   : > { %2507 = vrcp.f32 %v1638_v59 }
 0x62d   : > { %v2508_v6 = vpop.eup %2507 }
 0x62e   : > { %v1644_v11 = vmul.f32 %v2508_v6, %v1346_v2 }
 0x630   : > { %v1645_v12 = vadd.f32 %v1644_v11, %v1627_v21 }
 0x632   : > { %2509 = vtanh.f32 %v1645_v12 }
 0x633   : > { %2511 = vrcp.f32 %v1639_v16 }
 0x63c   : > { %v2510_v29 = vpop.eup %2509 }
 0x63d   : > { %v1647_v25 = vsub.f32 %v3424_v60, %v2510_v29  ;;  %v2512_v7 = vpop.eup %2511 }
 0x63f   : > { %v1648_v41 = vmul.f32 %v2512_v7, %v1647_v25 }
 0x641   : > { %v1649_v49 = vadd.f32 %v2510_v29, %v1648_v41 }
 0x643   : > { %1650 = vst [vmem:[%s393_s18] sm:$0xff] %v1649_v49 }
 0x644   : > { %2672 = shalt.err (!%p2669_p2)
}
 0x645   : > { %s2673_s3 = scalar_lea.hbm %s3515_s21, 128  ;;  %s2677_s9 = scalar_lea.hbm %s3566_s7, 256 }
 0x646   : > { %p2674_p5 = scmp.ne.s32.totalorder %s3515_s21, %s2673_s3  ;;  %p2678_p0 = scmp.lt.u32.totalorder %s3515_s21, %s3566_s7 }
 0x647   : > { %p2679_p7 = scmp.lt.u32.totalorder %s2677_s9, %s2673_s3  ;;  %p2681_p6 = scmp.lt.u32.totalorder %s2673_s3, %s3515_s21 }
 0x648   : > { %p2675_p12 = pnand %p2674_p5, %p3748_p10 }
 0x649   : > { %p2680_p1 = por %p2679_p7, %p2678_p0 }
 0x64a   : > { %p2676_p3 = pneg %p2675_p12 }
 0x64b   : > { %p2682_p8 = por %p2681_p6, %p2680_p1 }
 0x64d   : > { %p2683_p9 = pnand %p2682_p8, %p2676_p3 }
 0x64f   : > { %2686 = shalt.err (!%p2683_p9)
}
 0x650   : > { %2423 = dma.vmem_to_hbm [thread:$0]  (%p3748_p10), %s3517_s8, 128, %s3515_s21, %s1652_s22  }
 0x651 PF: > { %s3749_s12 = sld [smem:[#allocation16_spill]]  ;;  %s3750_s30 = sld [smem:[#allocation18_spill]] }
 0x652   : > { %s3751_s20 = sld [smem:[#allocation17_spill]] }
 0x657   : > { %s1677_s1 = sand.u32 1, %s3749_s12   ;;  %p3752_p11 = scmp.ne.s32.totalorder %s3750_s30, 0 }
 0x658   : > { %p3753_p4 = scmp.ge.s32.totalorder %s3751_s20, 2  ;;  %s1678_s27 = scalar_lea.sflag [#allocation4], %s1677_s1 }
 0x65a   : > { %p2443_p13 = pnand %p3753_p4, %p3752_p11 }
 0x65c   : > { %2716 = dma.done.wait (!%p2443_p13), %s1678_s27, 128  }
 0x65d   : > { %2718 = vsyncadd (!%p2443_p13), %s1678_s27, 4294967168  ;;  %s3754_s27 = sld [smem:[#allocation19_spill]]  ;;  %s3755_s16 = sld [smem:[#allocation20_spill]] }
 0x65e   : > { %s3756_s24 = smov %s2725_s25  ;;  %s3757_s25 = smov %s2729_s26 }
 0x663   : > { %p24_p2 = scmp.ge.s32.totalorder %s3754_s27, 4   ;;  %s3758_s26 = smov %s3755_s16 }
 0x665   :  { %26 = sbr.rel (!%p24_p2) target bundleno = 11 (0xb), region = 125 }
 0x66c   :  { %1683 = vsyncpa [#allocation3], 1 }
 0x66d   :  { %1685 = vsyncpa [#allocation3 + $0x1], 1 }
 0x66e   :  { %1686 = vsyncpa [#allocation6], 1 }
 0x66f   :  { %1688 = vsyncpa [#allocation6 + $0x1], 1 }
 0x670   :  { %1689 = vsyncpa [#allocation9], 1 }
 0x671   :  { %1690 = vsyncpa [#allocation4], 1 }
 0x672   :  { %1692 = vsyncpa [#allocation4 + $0x1], 1 }

</bundles_post_ra>
